<compile_context>
chip_gen: v6e
topology: v6e:2x2x1
jax: 0.10.0
libtpu: 0.0.40
codegen_flags: <defaults>
</compile_context>

<pallas_src>
import jax
import jax.numpy as jnp
from jax.experimental import pallas as pl
from jax.experimental.pallas import tpu as pltpu

COMPUTE_DTYPE = jnp.bfloat16   # MXU operand dtype; accumulation stays f32.


def _roundup(n, m):
    return ((n + m - 1) // m) * m


# ----------------------------- kernel ---------------------------------------

def deep_wide_kernel(x_ref, w1_ref, b1_ref, w2_ref, b2_ref,
                     w3_ref, b3_ref, w4_ref, b4_ref, o_ref):
    # Single fused chain: 4 MXU matmuls, f32 accumulation, f32 bias + ReLU.
    x = x_ref[...].astype(COMPUTE_DTYPE)
    h = jnp.dot(x, w1_ref[...], preferred_element_type=jnp.float32) + b1_ref[...]
    h = jnp.maximum(h, 0.0).astype(COMPUTE_DTYPE)
    h = jnp.dot(h, w2_ref[...], preferred_element_type=jnp.float32) + b2_ref[...]
    h = jnp.maximum(h, 0.0).astype(COMPUTE_DTYPE)
    h = jnp.dot(h, w3_ref[...], preferred_element_type=jnp.float32) + b3_ref[...]
    h = jnp.maximum(h, 0.0).astype(COMPUTE_DTYPE)
    out = jnp.dot(h, w4_ref[...], preferred_element_type=jnp.float32) + b4_ref[...]
    o_ref[...] = out.astype(o_ref.dtype)


# ----------------------------- tiling helpers --------------------------------

def _pick_batch_tile(bf, tb_req):
    """Pick the (folded-)batch tile: sublane(8)-aligned, and an even, >=2-step
    grid when possible so v7x's two TensorCores both get work."""
    tb = min(tb_req, bf)
    if tb < bf:
        tb = max(8, (tb // 8) * 8)

    def steps(t):
        return -(-bf // t)

    if steps(tb) == 1 and bf >= 16:
        half = _roundup(-(-bf // 2), 8)
        if half < bf:
            tb = half
    elif steps(tb) % 2 == 1:
        cand = _roundup(-(-bf // (steps(tb) + 1)), 8)
        if cand >= 8 and steps(cand) % 2 == 0:
            tb = cand
    return tb


# ----------------------------- wrapper ---------------------------------------

def deep_wide_mlp(x, packed, *, tb=1024, interpret=False):
    """x: [B, data_dim] float (f32 or bf16). packed: pack_params(). -> [B, out] f32.

    `tb` is the batch tile in *folded* rows (each folded row = `fold` original rows).
    """
    B, data_dim = x.shape
    fold = packed["fold"]
    out_dim = packed["out_dim"]
    assert data_dim == packed["data_dim"], "x feature dim mismatch vs packed params"
    assert B % fold == 0, "batch must be divisible by the pack fold factor"

    bf = B // fold
    in_f = data_dim * fold
    out_f = out_dim * fold

    # Row-major reshapes are free views (no data movement).
    xf = x.reshape(bf, in_f)

    tb = _pick_batch_tile(bf, tb)

    weight_keys = ("w1", "b1", "w2", "b2", "w3", "b3", "w4", "b4")
    w_args = [packed[k] for k in weight_keys]

    # ---- VMEM budget: lane-padded, double-buffered, keyed off the chip ----
    try:
        vmem_cap = int(pltpu.get_tpu_info().vmem_capacity_bytes)
    except Exception:
        vmem_cap = 64 * 1024 * 1024     # conservative (v7x per-TC physical)

    lane = 128
    w_bytes = sum(_roundup(int(w.shape[0]), 16) * _roundup(int(w.shape[1]), lane)
                  * w.dtype.itemsize for w in w_args)
    widest = max(int(packed[k].shape[1]) for k in ("w1", "w2", "w3", "w4"))

    def footprint(t):
        x_tile = 2 * t * _roundup(in_f, lane) * x.dtype.itemsize   # double-buffered
        o_tile = 2 * t * _roundup(out_f, lane) * 4
        inter = 6 * t * _roundup(widest, lane) * 4                  # f32 intermediates
        return x_tile + o_tile + inter + w_bytes

    usable = int(0.85 * vmem_cap)
    while tb > 8 and 2 * footprint(tb) > usable:
        tb = max(8, ((tb // 2) // 8) * 8)
    vmem_limit = int(min(usable, max(2 * footprint(tb), 16 * 1024 * 1024)))

    grid = (pl.cdiv(bf, tb),)
    batch_map = lambda i: (i, 0)
    const_map = lambda i: (0, 0)     # weights/biases: fetched once, VMEM-resident

    in_specs = [pl.BlockSpec((tb, in_f), batch_map)]
    in_specs += [pl.BlockSpec(tuple(int(d) for d in w.shape), const_map)
                 for w in w_args]

    # Advisory cost hint (dense folded FLOPs = what the MXU actually does).
    flops = 2 * bf * sum(int(packed[k].shape[0]) * int(packed[k].shape[1])
                         for k in ("w1", "w2", "w3", "w4"))
    bytes_accessed = (int(x.size) * x.dtype.itemsize
                      + sum(int(w.size) * w.dtype.itemsize for w in w_args)
                      + B * out_dim * 4)

    out = pl.pallas_call(
        deep_wide_kernel,
        out_shape=jax.ShapeDtypeStruct((bf, out_f), jnp.float32),
        grid=grid,
        in_specs=in_specs,
        out_specs=pl.BlockSpec((tb, out_f), batch_map),
        compiler_params=pltpu.CompilerParams(
            dimension_semantics=("parallel",),
            vmem_limit_bytes=vmem_limit),
        cost_estimate=pl.CostEstimate(
            flops=flops, transcendentals=0, bytes_accessed=bytes_accessed),
        interpret=interpret,
    )(xf, *w_args)
    return out.reshape(B, out_dim)


# ----------------------------- params ----------------------------------------

def init_params(key, deep_data_dim, side_dim, output_dim, hdims):
    """uniform(-0.05, 0.05) init matching DeepWideMLP.init_params().
    Weights stored as [in, out] (transposed vs torch.nn.Linear.weight)."""
    sizes = [deep_data_dim] + list(hdims) + [output_dim]
    keys = jax.random.split(key, 2 * (len(sizes) - 1) + 1)
    params = {}
    ki = 0
    for li, (din, dout) in enumerate(zip(sizes[:-1], sizes[1:]), start=1):
        params[f"w{li}"] = jax.random.uniform(
            keys[ki], (din, dout), jnp.float32, -0.05, 0.05); ki += 1
        params[f"b{li}"] = jax.random.uniform(
            keys[ki], (1, dout), jnp.float32, -0.05, 0.05); ki += 1
    params["ww"] = jax.random.uniform(
        keys[ki], (side_dim, output_dim), jnp.float32, -0.05, 0.05)
    return params


def pack_params(params, deep_data_dim, side_dim, *, fold=4,
                compute_dtype=COMPUTE_DTYPE):
    """Exact one-time weight surgery.

    Step 1 — fuse slicing + wide path into one 4-layer tower:
      * w1 zero-padded over the side-feature rows -> layer 1 consumes full x.
      * 2*side passthrough channels carry relu(s) and relu(-s) through the
        hidden layers with +/-identity blocks (zero bias); the last layer uses
        [w4; ww; -ww], so  out = h@w4 + s@ww + b4  exactly.

    Step 2 — block-diagonal batch fold (default 4; use 2 on v5e's 128-wide MXU):
      weights -> kron(eye(fold), w), biases tiled.  Combined with the free
      [B, d] -> [B/fold, d*fold] view of x this makes every matmul lane-dense
      and cuts MXU push count by ~fold on 256-wide MXUs, with zero extra HBM.
    """
    deep, side = deep_data_dim, side_dim
    h1 = params["w1"].shape[1]
    h2 = params["w2"].shape[1]
    h3 = params["w3"].shape[1]
    out_dim = params["w4"].shape[1]
    p = 2 * side
    f32 = jnp.float32

    w1a = jnp.zeros((deep + side, h1 + p), f32)
    w1a = w1a.at[:deep, :h1].set(params["w1"])
    eye_s = jnp.eye(side, dtype=f32)
    w1a = w1a.at[deep:, h1:h1 + side].set(eye_s)
    w1a = w1a.at[deep:, h1 + side:].set(-eye_s)
    b1a = jnp.concatenate([params["b1"], jnp.zeros((1, p), f32)], axis=1)

    def mid(w, b, hin, hout):
        wa = jnp.zeros((hin + p, hout + p), f32)
        wa = wa.at[:hin, :hout].set(w)
        wa = wa.at[hin:, hout:].set(jnp.eye(p, dtype=f32))
        ba = jnp.concatenate([b, jnp.zeros((1, p), f32)], axis=1)
        return wa, ba

    w2a, b2a = mid(params["w2"], params["b2"], h1, h2)
    w3a, b3a = mid(params["w3"], params["b3"], h2, h3)
    w4a = jnp.concatenate([params["w4"], params["ww"], -params["ww"]], axis=0)
    b4a = params["b4"]

    eye_f = jnp.eye(fold, dtype=f32)
    bd = lambda w: jnp.kron(eye_f, w)
    tile_b = lambda b: jnp.tile(b, (1, fold))

    packed = {"w1": bd(w1a), "w2": bd(w2a), "w3": bd(w3a), "w4": bd(w4a),
              "b1": tile_b(b1a), "b2": tile_b(b2a),
              "b3": tile_b(b3a), "b4": tile_b(b4a)}
    for k in ("w1", "w2", "w3", "w4"):
        packed[k] = packed[k].astype(compute_dtype)
    packed["fold"] = int(fold)
    packed["data_dim"] = int(deep + side)
    packed["out_dim"] = int(out_dim)
    return packed


# ----------------------------- references ------------------------------------

def reference_f32(x, params, deep_data_dim):
    """Pure f32 eval-mode module semantics."""
    xd = x[:, :deep_data_dim]
    xs = x[:, deep_data_dim:]
    h = jnp.maximum(xd @ params["w1"] + params["b1"], 0.0)
    h = jnp.maximum(h @ params["w2"] + params["b2"], 0.0)
    h = jnp.maximum(h @ params["w3"] + params["b3"], 0.0)
    hx = h @ params["w4"] + params["b4"]
    hs = xs @ params["ww"]
    return hx + hs


def reference_bf16(x, params, deep_data_dim):
    """Mirror of the kernel numerics: bf16 operands, f32 accumulation."""
    c = COMPUTE_DTYPE
    xd = x[:, :deep_data_dim].astype(c)
    xs = x[:, deep_data_dim:].astype(c)

    def dot(a, wk):
        return jnp.dot(a, params[wk].astype(c), preferred_element_type=jnp.float32)

    h = jnp.maximum(dot(xd, "w1") + params["b1"], 0.0).astype(c)
    h = jnp.maximum(dot(h, "w2") + params["b2"], 0.0).astype(c)
    h = jnp.maximum(dot(h, "w3") + params["b3"], 0.0).astype(c)
    hx = dot(h, "w4") + params["b4"]
    hs = dot(xs, "ww")
    return hx + hs


# ----------------------------- demo ------------------------------------------

if __name__ == "__main__":
    side_dim = 16
    deep_data_dim = 32
    data_dim = deep_data_dim + side_dim   # 48
    output_dim = 8
    hdims = [32, 32, 32]

    key = jax.random.PRNGKey(0)
    k_x, k_p, k_x2 = jax.random.split(key, 3)
    params = init_params(k_p, deep_data_dim, side_dim, output_dim, hdims)
    packed = pack_params(params, deep_data_dim, side_dim, fold=4)

    # Main run: batch=1024 -> folded batch 256; the tile picker splits it into
    # an even 2-step grid so both v7x TensorCores get work.
    batch = 1024
    x = jax.random.normal(k_x, (batch, data_dim), jnp.float32)
    out = jax.block_until_ready(deep_wide_mlp(x, packed))
    assert out.shape == (batch, output_dim)

    # Strict check vs a reference that mirrors the kernel's bf16/f32 numerics.
    ref_b = reference_bf16(x, params, deep_data_dim)
    assert jnp.allclose(out, ref_b, atol=1e-3, rtol=1e-3), "mismatch vs bf16 mirror"
    # Loose check vs pure-f32 module semantics (difference is bf16 rounding only).
    ref_f = reference_f32(x, params, deep_data_dim)
    assert jnp.allclose(out, ref_f, atol=2e-2, rtol=2e-2), "mismatch vs f32 reference"

    # Ragged-grid test: folded batch (272) not a multiple of the chosen tile ->
    # last block exercises masked OOB reads / masked writeback (rows independent).
    batch2 = 1088
    x2 = jax.random.normal(k_x2, (batch2, data_dim), jnp.float32)
    out2 = jax.block_until_ready(deep_wide_mlp(x2, packed, tb=96))
    assert out2.shape == (batch2, output_dim)
    ref2 = reference_bf16(x2, params, deep_data_dim)
    assert jnp.allclose(out2, ref2, atol=1e-3, rtol=1e-3), "mismatch on ragged grid"

    print("KERNEL_OK")
</pallas_src>

<mosaic_0001>
module attributes {stable_mosaic.version = 11 : i64} {
  func.func @deep_wide_kernel(%arg0: i32, %arg1: memref<128x192xf32, #tpu.memory_space<vmem>>, %arg2: memref<192x256xbf16, #tpu.memory_space<vmem>>, %arg3: memref<1x256xf32, #tpu.memory_space<vmem>>, %arg4: memref<256x256xbf16, #tpu.memory_space<vmem>>, %arg5: memref<1x256xf32, #tpu.memory_space<vmem>>, %arg6: memref<256x256xbf16, #tpu.memory_space<vmem>>, %arg7: memref<1x256xf32, #tpu.memory_space<vmem>>, %arg8: memref<256x32xbf16, #tpu.memory_space<vmem>>, %arg9: memref<1x32xf32, #tpu.memory_space<vmem>>, %arg10: memref<128x32xf32, #tpu.memory_space<vmem>>) attributes {dimension_semantics = [#tpu.dimension_semantics<parallel>], iteration_bounds = array<i64: 2>, scalar_prefetch = 0 : i64, scratch_operands = 0 : i64, tpu.core_type = #tpu.core_type<tc>, window_params = [{transform_indices = @transform_0, window_bounds = array<i64: 128, 192>}, {pipeline_mode = #tpu.pipeline_mode<synchronous>, transform_indices = @transform_1, window_bounds = array<i64: 192, 256>}, {pipeline_mode = #tpu.pipeline_mode<synchronous>, transform_indices = @transform_2, window_bounds = array<i64: 1, 256>}, {pipeline_mode = #tpu.pipeline_mode<synchronous>, transform_indices = @transform_3, window_bounds = array<i64: 256, 256>}, {pipeline_mode = #tpu.pipeline_mode<synchronous>, transform_indices = @transform_4, window_bounds = array<i64: 1, 256>}, {pipeline_mode = #tpu.pipeline_mode<synchronous>, transform_indices = @transform_5, window_bounds = array<i64: 256, 256>}, {pipeline_mode = #tpu.pipeline_mode<synchronous>, transform_indices = @transform_6, window_bounds = array<i64: 1, 256>}, {pipeline_mode = #tpu.pipeline_mode<synchronous>, transform_indices = @transform_7, window_bounds = array<i64: 256, 32>}, {pipeline_mode = #tpu.pipeline_mode<synchronous>, transform_indices = @transform_8, window_bounds = array<i64: 1, 32>}, {transform_indices = @transform_9, window_bounds = array<i64: 128, 32>}]} {
    %c0 = arith.constant 0 : index
    %c0_0 = arith.constant 0 : index
    %0 = vector.load %arg1[%c0, %c0_0] : memref<128x192xf32, #tpu.memory_space<vmem>>, vector<128x192xf32>
    %1 = arith.truncf %0 : vector<128x192xf32> to vector<128x192xbf16>
    %c0_1 = arith.constant 0 : index
    %c0_2 = arith.constant 0 : index
    %2 = vector.load %arg2[%c0_1, %c0_2] : memref<192x256xbf16, #tpu.memory_space<vmem>>, vector<192x256xbf16>
    %cst = arith.constant dense<0.000000e+00> : vector<128x256xf32>
    %3 = tpu.matmul %1, %2, %cst {dimension_numbers = #tpu.dot_dimension_numbers<[1], [0], [0], [1], [0, 0, 1, 1], [], []>} : vector<128x192xbf16>, vector<192x256xbf16>, vector<128x256xf32> -> vector<128x256xf32>
    %c0_3 = arith.constant 0 : index
    %c0_4 = arith.constant 0 : index
    %4 = vector.load %arg3[%c0_3, %c0_4] : memref<1x256xf32, #tpu.memory_space<vmem>>, vector<1x256xf32>
    %5 = vector.broadcast %4 : vector<1x256xf32> to vector<128x256xf32>
    %6 = arith.addf %3, %5 : vector<128x256xf32>
    %cst_5 = arith.constant 0.000000e+00 : f32
    %7 = vector.broadcast %cst_5 : f32 to vector<128x256xf32>
    %8 = arith.maximumf %6, %7 : vector<128x256xf32>
    %9 = arith.truncf %8 : vector<128x256xf32> to vector<128x256xbf16>
    %c0_6 = arith.constant 0 : index
    %c0_7 = arith.constant 0 : index
    %10 = vector.load %arg4[%c0_6, %c0_7] : memref<256x256xbf16, #tpu.memory_space<vmem>>, vector<256x256xbf16>
    %cst_8 = arith.constant dense<0.000000e+00> : vector<128x256xf32>
    %11 = tpu.matmul %9, %10, %cst_8 {dimension_numbers = #tpu.dot_dimension_numbers<[1], [0], [0], [1], [0, 0, 1, 1], [], []>} : vector<128x256xbf16>, vector<256x256xbf16>, vector<128x256xf32> -> vector<128x256xf32>
    %c0_9 = arith.constant 0 : index
    %c0_10 = arith.constant 0 : index
    %12 = vector.load %arg5[%c0_9, %c0_10] : memref<1x256xf32, #tpu.memory_space<vmem>>, vector<1x256xf32>
    %13 = vector.broadcast %12 : vector<1x256xf32> to vector<128x256xf32>
    %14 = arith.addf %11, %13 : vector<128x256xf32>
    %cst_11 = arith.constant 0.000000e+00 : f32
    %15 = vector.broadcast %cst_11 : f32 to vector<128x256xf32>
    %16 = arith.maximumf %14, %15 : vector<128x256xf32>
    %17 = arith.truncf %16 : vector<128x256xf32> to vector<128x256xbf16>
    %c0_12 = arith.constant 0 : index
    %c0_13 = arith.constant 0 : index
    %18 = vector.load %arg6[%c0_12, %c0_13] : memref<256x256xbf16, #tpu.memory_space<vmem>>, vector<256x256xbf16>
    %cst_14 = arith.constant dense<0.000000e+00> : vector<128x256xf32>
    %19 = tpu.matmul %17, %18, %cst_14 {dimension_numbers = #tpu.dot_dimension_numbers<[1], [0], [0], [1], [0, 0, 1, 1], [], []>} : vector<128x256xbf16>, vector<256x256xbf16>, vector<128x256xf32> -> vector<128x256xf32>
    %c0_15 = arith.constant 0 : index
    %c0_16 = arith.constant 0 : index
    %20 = vector.load %arg7[%c0_15, %c0_16] : memref<1x256xf32, #tpu.memory_space<vmem>>, vector<1x256xf32>
    %21 = vector.broadcast %20 : vector<1x256xf32> to vector<128x256xf32>
    %22 = arith.addf %19, %21 : vector<128x256xf32>
    %cst_17 = arith.constant 0.000000e+00 : f32
    %23 = vector.broadcast %cst_17 : f32 to vector<128x256xf32>
    %24 = arith.maximumf %22, %23 : vector<128x256xf32>
    %25 = arith.truncf %24 : vector<128x256xf32> to vector<128x256xbf16>
    %c0_18 = arith.constant 0 : index
    %c0_19 = arith.constant 0 : index
    %26 = vector.load %arg8[%c0_18, %c0_19] : memref<256x32xbf16, #tpu.memory_space<vmem>>, vector<256x32xbf16>
    %cst_20 = arith.constant dense<0.000000e+00> : vector<128x32xf32>
    %27 = tpu.matmul %25, %26, %cst_20 {dimension_numbers = #tpu.dot_dimension_numbers<[1], [0], [0], [1], [0, 0, 1, 1], [], []>} : vector<128x256xbf16>, vector<256x32xbf16>, vector<128x32xf32> -> vector<128x32xf32>
    %c0_21 = arith.constant 0 : index
    %c0_22 = arith.constant 0 : index
    %28 = vector.load %arg9[%c0_21, %c0_22] : memref<1x32xf32, #tpu.memory_space<vmem>>, vector<1x32xf32>
    %29 = vector.broadcast %28 : vector<1x32xf32> to vector<128x32xf32>
    %30 = arith.addf %27, %29 : vector<128x32xf32>
    %c0_23 = arith.constant 0 : index
    %c0_24 = arith.constant 0 : index
    %31 = vector.load %arg10[%c0_23, %c0_24] : memref<128x32xf32, #tpu.memory_space<vmem>>, vector<128x32xf32>
    tpu.vector_store %arg10[%c0_23, %c0_24], %30 {strides = array<i32>} : memref<128x32xf32, #tpu.memory_space<vmem>>, vector<128x32xf32>,
    return
  }
  func.func @transform_0(%arg0: i32) -> (i32, i32) {
    %c0_i32 = arith.constant 0 : i32
    %c0_i32_0 = arith.constant 0 : i32
    return %arg0, %c0_i32 : i32, i32
  }
  func.func @transform_1(%arg0: i32) -> (i32, i32) {
    %c0_i32 = arith.constant 0 : i32
    %c0_i32_0 = arith.constant 0 : i32
    %c0_i32_1 = arith.constant 0 : i32
    return %c0_i32, %c0_i32_0 : i32, i32
  }
  func.func @transform_2(%arg0: i32) -> (i32, i32) {
    %c0_i32 = arith.constant 0 : i32
    %c0_i32_0 = arith.constant 0 : i32
    %c0_i32_1 = arith.constant 0 : i32
    return %c0_i32, %c0_i32_0 : i32, i32
  }
  func.func @transform_3(%arg0: i32) -> (i32, i32) {
    %c0_i32 = arith.constant 0 : i32
    %c0_i32_0 = arith.constant 0 : i32
    %c0_i32_1 = arith.constant 0 : i32
    return %c0_i32, %c0_i32_0 : i32, i32
  }
  func.func @transform_4(%arg0: i32) -> (i32, i32) {
    %c0_i32 = arith.constant 0 : i32
    %c0_i32_0 = arith.constant 0 : i32
    %c0_i32_1 = arith.constant 0 : i32
    return %c0_i32, %c0_i32_0 : i32, i32
  }
  func.func @transform_5(%arg0: i32) -> (i32, i32) {
    %c0_i32 = arith.constant 0 : i32
    %c0_i32_0 = arith.constant 0 : i32
    %c0_i32_1 = arith.constant 0 : i32
    return %c0_i32, %c0_i32_0 : i32, i32
  }
  func.func @transform_6(%arg0: i32) -> (i32, i32) {
    %c0_i32 = arith.constant 0 : i32
    %c0_i32_0 = arith.constant 0 : i32
    %c0_i32_1 = arith.constant 0 : i32
    return %c0_i32, %c0_i32_0 : i32, i32
  }
  func.func @transform_7(%arg0: i32) -> (i32, i32) {
    %c0_i32 = arith.constant 0 : i32
    %c0_i32_0 = arith.constant 0 : i32
    %c0_i32_1 = arith.constant 0 : i32
    return %c0_i32, %c0_i32_0 : i32, i32
  }
  func.func @transform_8(%arg0: i32) -> (i32, i32) {
    %c0_i32 = arith.constant 0 : i32
    %c0_i32_0 = arith.constant 0 : i32
    %c0_i32_1 = arith.constant 0 : i32
    return %c0_i32, %c0_i32_0 : i32, i32
  }
  func.func @transform_9(%arg0: i32) -> (i32, i32) {
    %c0_i32 = arith.constant 0 : i32
    %c0_i32_0 = arith.constant 0 : i32
    return %arg0, %c0_i32 : i32, i32
  }
}

</mosaic_0001>

<bundles_post_ra>
// kernel: tpu_custom_call.1
= control target key start
LH: loop header
LB: loop body
LE: loop exit
PB: predicated region body
PF: predicated region fallthrough
CT: control target
= control target key end

     0   :  { %s2185_s30 = smov 0   ;;  %s2762_s0 = inlined_call_operand.vmem [shape: f32[256,192], index: 0, kind: input, shape index: {}]   ;;  %s2763_s1 = inlined_call_operand.vmem [shape: bf16[192,256], index: 1, kind: input, shape index: {}]   ;;  %s2764_s2 = inlined_call_operand.vmem [shape: f32[1,256], index: 2, kind: input, shape index: {}]   ;;  %s2765_s3 = inlined_call_operand.vmem [shape: bf16[256,256], index: 3, kind: input, shape index: {}]   ;;  %s2766_s4 = inlined_call_operand.vmem [shape: f32[1,256], index: 4, kind: input, shape index: {}]   ;;  %s2767_s5 = inlined_call_operand.vmem [shape: bf16[256,256], index: 5, kind: input, shape index: {}]   ;;  %s2768_s6 = inlined_call_operand.vmem [shape: f32[1,256], index: 6, kind: input, shape index: {}]   ;;  %s2769_s7 = inlined_call_operand.vmem [shape: bf16[256,32], index: 7, kind: input, shape index: {}]   ;;  %s2770_s8 = inlined_call_operand.vmem [shape: f32[1,32], index: 8, kind: input, shape index: {}]   ;;  %s2771_s9 = inlined_call_operand.vmem [shape: f32[256,32], index: 9, kind: output, shape index: {}]  }
   0x1 LB: > { %s1765_s10 = sadd.s32 4294967295, %s2133_s30   ;;  %p1769_p0 = scmp.ge.s32.totalorder %s2133_s30, 1  ;;  %s2133_s30 = sphi %s2185_s30, %s19_s30  }
   0x2   : > { %p289_p1 = scmp.lt.s32.totalorder %s2133_s30, 3 }
   0x4   : > { %p290_p2 = pnand %p1769_p0, %p289_p1 }
   0x5   : > { %s1770_s13 = sshll.u32 (!%p290_p2), %s1765_s10, 4 }
   0x6   : > { %293 = sbr.rel (%p290_p2) target bundleno = 938 (0x3aa), region = 56  ;;  %p327_p3 = scmp.lt.s32.totalorder (!%p290_p2), %s1770_s13, 31 }
   0xb   : > { %v1979_v0 = vld [vmem:[%s2763_s1 + $0x74] ss:$8 sps:$4 sm:$0xff]   ;;  %v1981_v1 = vld [vmem:[%s2763_s1 + $0x70] ss:$8 sps:$4 sm:$0xff]   ;;  %v1982_v2 = vld [vmem:[%s2763_s1 + $0x64] ss:$8 sps:$4 sm:$0xff]  }
   0xc   : > { %569 = vmatprep.subr.bf16.mxu0 %v1979_v0  ;;  %v1984_v3 = vld [vmem:[%s2763_s1 + $0x60] ss:$8 sps:$4 sm:$0xff]   ;;  %v1985_v4 = vld [vmem:[%s2763_s1 + $0x54] ss:$8 sps:$4 sm:$0xff]   ;;  %s2773_s13 = smov (!%p327_p3, %s1770_s13), 31  ;;  %vm544_vm0 = vcmask 523264  }
   0xd   : > { %570 = vmatpush1.bf16.msra.mxu0 %v1981_v1  ;;  %v1987_v5 = vld [vmem:[%s2763_s1 + $0x50] ss:$8 sps:$4 sm:$0xff]   ;;  %v1988_v6 = vld [vmem:[%s2763_s1 + $0x44] ss:$8 sps:$4 sm:$0xff]   ;;  %s1890_s26 = sshll.u32 %s2773_s13, 4  ;;  %s1774_s25 = sshll.u32 %s2773_s13, 3 }
   0xe   : > { %571 = vmatprep.subr.bf16.mxu0 %v1982_v2  ;;  %v1990_v7 = vld [vmem:[%s2763_s1 + $0x40] ss:$8 sps:$4 sm:$0xff]   ;;  %v1991_v8 = vld [vmem:[%s2763_s1 + $0x34] ss:$8 sps:$4 sm:$0xff]   ;;  %s2226_s14 = scalar_lea.vmem %s2762_s0, %s1890_s26  ;;  %v1993_v9 = vld [vmem:[%s2763_s1 + $0x30] ss:$8 sps:$4 sm:$0xff]   ;;  %s2709_s10 = scalar_lea.vmem %s2771_s9, %s1774_s25 }
   0xf   : > { %v1994_v10 = vld [vmem:[%s2763_s1 + $0x24] ss:$8 sps:$4 sm:$0xff]   ;;  %v343_v12 = vld [vmem:[%s2226_s14 + $0x18] sm:$0xff]  ;;  %v1996_v14 = vld [vmem:[%s2763_s1 + $0x20] ss:$8 sps:$4 sm:$0xff]   ;;  %vm1692_vm1 = vcmask 261120  }
  0x10   : > { %v341_v11 = vld [vmem:[%s2226_s14 + $0x8] sm:$0xff]  ;;  %v1997_v15 = vld [vmem:[%s2763_s1 + $0x14] ss:$8 sps:$4 sm:$0xff]   ;;  %v1999_v16 = vld [vmem:[%s2763_s1 + $0x10] ss:$8 sps:$4 sm:$0xff]  }
  0x11   : > { %572 = vmatpush1.bf16.msra.mxu0 %v1984_v3  ;;  %v373_v13 = vpack.c.bf16 %v343_v12, %v341_v11  ;;  %v2000_v17 = vld [vmem:[%s2763_s1 + $0x4] ss:$8 sps:$4 sm:$0xff]   ;;  %v2002_v18 = vld [vmem:[%s2763_s1] ss:$8 sps:$4 sm:$0xff]   ;;  %v2003_v19 = vld [vmem:[%s2763_s1 + $0xb4] ss:$8 sps:$4 sm:$0xff]  }
  0x12   : > { %573 = vmatprep.subr.bf16.mxu0 %v1985_v4  ;;  %v2015_v20 = vld [vmem:[%s2765_s3 + $0x74] ss:$8 sps:$4 sm:$0xff]   ;;  %v2017_v21 = vld [vmem:[%s2765_s3 + $0x70] ss:$8 sps:$4 sm:$0xff]   ;;  %v2018_v22 = vld [vmem:[%s2765_s3 + $0x64] ss:$8 sps:$4 sm:$0xff]  }
  0x13   : > { %1799 = vmatprep.mubr.msk.bf16.mxu0 %vm544_vm0, %v373_v13  ;;  %934 = vmatprep.subr.bf16.mxu1 %v2015_v20  ;;  %v2020_v23 = vld [vmem:[%s2765_s3 + $0x60] ss:$8 sps:$4 sm:$0xff]   ;;  %v2005_v24 = vld [vmem:[%s2763_s1 + $0xb0] ss:$8 sps:$4 sm:$0xff]   ;;  %v2021_v25 = vld [vmem:[%s2765_s3 + $0x54] ss:$8 sps:$4 sm:$0xff]  }
  0x14   : > { %935 = vmatpush1.bf16.msra.mxu1 %v2017_v21  ;;  %v2006_v26 = vld [vmem:[%s2763_s1 + $0xa4] ss:$8 sps:$4 sm:$0xff]   ;;  %v2023_v27 = vld [vmem:[%s2765_s3 + $0x50] ss:$8 sps:$4 sm:$0xff]   ;;  %v2008_v28 = vld [vmem:[%s2763_s1 + $0xa0] ss:$8 sps:$4 sm:$0xff]  }
  0x15   : > { %574 = vmatpush1.bf16.msra.mxu0 %v1987_v5  ;;  %936 = vmatprep.subr.bf16.mxu1 %v2018_v22  ;;  %v2024_v29 = vld [vmem:[%s2765_s3 + $0x44] ss:$8 sps:$4 sm:$0xff]   ;;  %v2009_v30 = vld [vmem:[%s2763_s1 + $0x94] ss:$8 sps:$4 sm:$0xff]   ;;  %v2026_v31 = vld [vmem:[%s2765_s3 + $0x40] ss:$8 sps:$4 sm:$0xff]  }
  0x16   : > { %575 = vmatprep.subr.bf16.mxu0 %v1988_v6  ;;  %v2011_v32 = vld [vmem:[%s2763_s1 + $0x90] ss:$8 sps:$4 sm:$0xff]   ;;  %v2027_v33 = vld [vmem:[%s2765_s3 + $0x34] ss:$8 sps:$4 sm:$0xff]   ;;  %v2012_v34 = vld [vmem:[%s2763_s1 + $0x84] ss:$8 sps:$4 sm:$0xff]  }
  0x17   : > { %v2014_v35 = vld [vmem:[%s2763_s1 + $0x80] ss:$8 sps:$4 sm:$0xff]   ;;  %v342_v37 = vld [vmem:[%s2226_s14 + $0x10] sm:$0xff]  ;;  %v347_v40 = vld [vmem:[%s2226_s14 + $0x38] sm:$0xff] }
  0x18   : > { %937 = vmatpush1.bf16.msra.mxu1 %v2020_v23  ;;  %v340_v36 = vld [vmem:[%s2226_s14] sm:$0xff]  ;;  %v345_v38 = vld [vmem:[%s2226_s14 + $0x28] sm:$0xff]  ;;  %v2029_v39 = vld [vmem:[%s2765_s3 + $0x30] ss:$8 sps:$4 sm:$0xff]  }
  0x19   : > { %576 = vmatpush1.bf16.msra.mxu0 %v1990_v7  ;;  %938 = vmatprep.subr.bf16.mxu1 %v2021_v25  ;;  %v2030_v41 = vld [vmem:[%s2765_s3 + $0x24] ss:$8 sps:$4 sm:$0xff]   ;;  %v2032_v42 = vld [vmem:[%s2765_s3 + $0x20] ss:$8 sps:$4 sm:$0xff]   ;;  %v2033_v43 = vld [vmem:[%s2765_s3 + $0x14] ss:$8 sps:$4 sm:$0xff]   ;;  %v372_v44 = vpack.c.bf16 %v342_v37, %v340_v36  ;;  %v375_v45 = vpack.c.bf16 %v347_v40, %v345_v38 }
  0x1a   : > { %577 = vmatprep.subr.bf16.mxu0 %v1991_v8  ;;  %v2035_v46 = vld [vmem:[%s2765_s3 + $0x10] ss:$8 sps:$4 sm:$0xff]   ;;  %v344_v47 = vld [vmem:[%s2226_s14 + $0x20] sm:$0xff]  ;;  %v349_v50 = vld [vmem:[%s2226_s14 + $0x48] sm:$0xff] }
  0x1b   : > { %v346_v48 = vld [vmem:[%s2226_s14 + $0x30] sm:$0xff]  ;;  %v2036_v49 = vld [vmem:[%s2765_s3 + $0x4] ss:$8 sps:$4 sm:$0xff]   ;;  %v351_v51 = vld [vmem:[%s2226_s14 + $0x58] sm:$0xff] }
  0x1c   : > { %939 = vmatpush1.bf16.msra.mxu1 %v2023_v27  ;;  %v2038_v52 = vld [vmem:[%s2765_s3] ss:$8 sps:$4 sm:$0xff]   ;;  %v2039_v53 = vld [vmem:[%s2765_s3 + $0xf4] ss:$8 sps:$4 sm:$0xff]   ;;  %v374_v54 = vpack.c.bf16 %v346_v48, %v344_v47  ;;  %v377_v55 = vpack.c.bf16 %v351_v51, %v349_v50  ;;  %v2041_v56 = vld [vmem:[%s2765_s3 + $0xf0] ss:$8 sps:$4 sm:$0xff]  }
  0x1d   : > { %578 = vmatpush1.bf16.msra.mxu0 %v1993_v9  ;;  %940 = vmatprep.subr.bf16.mxu1 %v2024_v29  ;;  %v348_v57 = vld [vmem:[%s2226_s14 + $0x40] sm:$0xff]  ;;  %v350_v58 = vld [vmem:[%s2226_s14 + $0x50] sm:$0xff]  ;;  %v353_v60 = vld [vmem:[%s2226_s14 + $0x68] sm:$0xff] }
  0x1e   : > { %579 = vmatprep.subr.bf16.mxu0 %v1994_v10  ;;  %v2042_v59 = vld [vmem:[%s2765_s3 + $0xe4] ss:$8 sps:$4 sm:$0xff]   ;;  %v355_v61 = vld [vmem:[%s2226_s14 + $0x78] sm:$0xff]  ;;  %v2044_v62 = vld [vmem:[%s2765_s3 + $0xe0] ss:$8 sps:$4 sm:$0xff]   ;;  %v376_v0 = vpack.c.bf16 %v350_v58, %v348_v57 }
  0x1f   : > { %v2045_v63 = vld [vmem:[%s2765_s3 + $0xd4] ss:$8 sps:$4 sm:$0xff]   ;;  %v379_v1 = vpack.c.bf16 %v355_v61, %v353_v60  ;;  %v2047_v2 = vld [vmem:[%s2765_s3 + $0xd0] ss:$8 sps:$4 sm:$0xff]   ;;  %v352_v3 = vld [vmem:[%s2226_s14 + $0x60] sm:$0xff] }
  0x20   : > { %941 = vmatpush1.bf16.msra.mxu1 %v2026_v31  ;;  %v354_v4 = vld [vmem:[%s2226_s14 + $0x70] sm:$0xff]  ;;  %v2048_v5 = vld [vmem:[%s2765_s3 + $0xc4] ss:$8 sps:$4 sm:$0xff]   ;;  %v359_v7 = vld [vmem:[%s2226_s14 + $0x98] sm:$0xff] }
  0x21   : > { %580 = vmatpush1.bf16.msra.mxu0 %v1996_v14  ;;  %942 = vmatprep.subr.bf16.mxu1 %v2027_v33  ;;  %v357_v6 = vld [vmem:[%s2226_s14 + $0x88] sm:$0xff]  ;;  %v378_v8 = vpack.c.bf16 %v354_v4, %v352_v3  ;;  %v2051_v11 = vld [vmem:[%s2765_s3 + $0xb4] ss:$8 sps:$4 sm:$0xff]   ;;  %v2053_v12 = vld [vmem:[%s2765_s3 + $0xb0] ss:$8 sps:$4 sm:$0xff]  }
  0x22   : > { %581 = vmatprep.subr.bf16.mxu0 %v1997_v15  ;;  %v2050_v9 = vld [vmem:[%s2765_s3 + $0xc0] ss:$8 sps:$4 sm:$0xff]   ;;  %v381_v10 = vpack.c.bf16 %v359_v7, %v357_v6  ;;  %v358_v14 = vld [vmem:[%s2226_s14 + $0x90] sm:$0xff]  ;;  %v367_v22 = vld [vmem:[%s2226_s14 + $0xd8] sm:$0xff] }
  0x23   : > { %v356_v13 = vld [vmem:[%s2226_s14 + $0x80] sm:$0xff]  ;;  %v361_v15 = vld [vmem:[%s2226_s14 + $0xa8] sm:$0xff]  ;;  %v362_v20 = vld [vmem:[%s2226_s14 + $0xb0] sm:$0xff] }
  0x24   : > { %943 = vmatpush1.bf16.msra.mxu1 %v2029_v39  ;;  %v365_v21 = vld [vmem:[%s2226_s14 + $0xc8] sm:$0xff]  ;;  %v364_v25 = vld [vmem:[%s2226_s14 + $0xc0] sm:$0xff]  ;;  %v2057_v36 = vld [vmem:[%s2765_s3 + $0x94] ss:$8 sps:$4 sm:$0xff]  }
  0x25   : > { %582 = vmatpush1.bf16.msra.mxu0 %v1999_v16  ;;  %944 = vmatprep.subr.bf16.mxu1 %v2030_v41  ;;  %v363_v16 = vld [vmem:[%s2226_s14 + $0xb8] sm:$0xff]  ;;  %v369_v27 = vld [vmem:[%s2226_s14 + $0xe8] sm:$0xff]  ;;  %v368_v31 = vld [vmem:[%s2226_s14 + $0xe0] sm:$0xff] }
  0x26   : > { %583 = vmatprep.subr.bf16.mxu0 %v2000_v17  ;;  %v380_v17 = vpack.c.bf16 %v358_v14, %v356_v13  ;;  %v2059_v37 = vld [vmem:[%s2765_s3 + $0x90] ss:$8 sps:$4 sm:$0xff]   ;;  %v2060_v38 = vld [vmem:[%s2765_s3 + $0x84] ss:$8 sps:$4 sm:$0xff]   ;;  %v2062_v39 = vld [vmem:[%s2765_s3 + $0x80] ss:$8 sps:$4 sm:$0xff]  }
  0x27   : > { %v2063_v40 = vld [vmem:[%s2767_s5 + $0x70] ss:$8 sps:$4 sm:$0xff]   ;;  %v2065_v41 = vld [vmem:[%s2767_s5 + $0x74] ss:$8 sps:$4 sm:$0xff]   ;;  %v2072_v47 = vld [vmem:[%s2767_s5 + $0x40] ss:$8 sps:$4 sm:$0xff]  }
  0x28   : > { %945 = vmatpush1.bf16.msra.mxu1 %v2032_v42  ;;  %v2068_v42 = vld [vmem:[%s2767_s5 + $0x64] ss:$8 sps:$4 sm:$0xff]   ;;  %v2077_v48 = vld [vmem:[%s2767_s5 + $0x34] ss:$8 sps:$4 sm:$0xff]   ;;  %v2078_v51 = vld [vmem:[%s2767_s5 + $0x20] ss:$8 sps:$4 sm:$0xff]  }
  0x29   : > { %584 = vmatpush1.bf16.msra.mxu0 %v2002_v18  ;;  %946 = vmatprep.subr.bf16.mxu1 %v2033_v43  ;;  %v383_v18 = vpack.c.bf16 %v363_v16, %v361_v15  ;;  %v2066_v43 = vld [vmem:[%s2767_s5 + $0x60] ss:$8 sps:$4 sm:$0xff]   ;;  %v2080_v50 = vld [vmem:[%s2767_s5 + $0x24] ss:$8 sps:$4 sm:$0xff]   ;;  %v2087_v57 = vld [vmem:[%s2767_s5 + $0xf0] ss:$8 sps:$4 sm:$0xff]  }
  0x2a   : > { %593 = vmatprep.subr.bf16.mxu0 %v2003_v19  ;;  %v360_v19 = vld [vmem:[%s2226_s14 + $0xa0] sm:$0xff]  ;;  %v2095_v60 = vld [vmem:[%s2767_s5 + $0xd4] ss:$8 sps:$4 sm:$0xff]   ;;  %v2093_v61 = vld [vmem:[%s2767_s5 + $0xd0] ss:$8 sps:$4 sm:$0xff]  }
  0x2b   : > { %v382_v23 = vpack.c.bf16 %v362_v20, %v360_v19  ;;  %v2092_v58 = vld [vmem:[%s2767_s5 + $0xe4] ss:$8 sps:$4 sm:$0xff]   ;;  %v412_v6 = vld [vmem:[%s2764_s2] sm:$0x3] }
  0x2c   : > { %947 = vmatpush1.bf16.msra.mxu1 %v2035_v46  ;;  %v2074_v46 = vld [vmem:[%s2767_s5 + $0x44] ss:$8 sps:$4 sm:$0xff]  }
  0x2d   : > { %594 = vmatpush2.bf16.msra.mxu0 %v2005_v24  ;;  %948 = vmatprep.subr.bf16.mxu1 %v2036_v49  ;;  %v385_v24 = vpack.c.bf16 %v367_v22, %v365_v21  ;;  %v2075_v49 = vld [vmem:[%s2767_s5 + $0x30] ss:$8 sps:$4 sm:$0xff]  }
  0x2e   : > { %595 = vmatprep.subr.bf16.mxu0 %v2006_v26  ;;  %v366_v26 = vld [vmem:[%s2226_s14 + $0xd0] sm:$0xff] }
  0x2f   : > { %v384_v29 = vpack.c.bf16 %v366_v26, %v364_v25 }
  0x30   : > { %949 = vmatpush1.bf16.msra.mxu1 %v2038_v52  ;;  %v2083_v52 = vld [vmem:[%s2767_s5 + $0x14] ss:$8 sps:$4 sm:$0xff]  }
  0x31   : > { %596 = vmatpush2.bf16.msra.mxu0 %v2008_v28  ;;  %950 = vmatprep.subr.bf16.mxu1 %v2039_v53  ;;  %v371_v28 = vld [vmem:[%s2226_s14 + $0xf8] sm:$0xff] }
  0x32   : > { %597 = vmatprep.subr.bf16.mxu0 %v2009_v30  ;;  %v387_v30 = vpack.c.bf16 %v371_v28, %v369_v27  ;;  %v2081_v53 = vld [vmem:[%s2767_s5 + $0x10] ss:$8 sps:$4 sm:$0xff]  }
  0x34   : > { %951 = vmatpush2.bf16.msra.mxu1 %v2041_v56  ;;  %v2089_v56 = vld [vmem:[%s2767_s5 + $0xf4] ss:$8 sps:$4 sm:$0xff]  }
  0x35   : > { %598 = vmatpush2.bf16.msra.mxu0 %v2011_v32  ;;  %952 = vmatprep.subr.bf16.mxu1 %v2042_v59  ;;  %v370_v32 = vld [vmem:[%s2226_s14 + $0xf0] sm:$0xff]  ;;  %v2090_v59 = vld [vmem:[%s2767_s5 + $0xe0] ss:$8 sps:$4 sm:$0xff]  }
  0x36   : > { %599 = vmatprep.subr.bf16.mxu0 %v2012_v34  ;;  %v386_v33 = vpack.c.bf16 %v370_v32, %v368_v31  ;;  %v2054_v34 = vld [vmem:[%s2765_s3 + $0xa4] ss:$8 sps:$4 sm:$0xff]  }
  0x38   : > { %953 = vmatpush2.bf16.msra.mxu1 %v2044_v62  ;;  %v2098_v62 = vld [vmem:[%s2767_s5 + $0xc4] ss:$8 sps:$4 sm:$0xff]  }
  0x39   : > { %600 = vmatpush2.bf16.msra.mxu0 %v2014_v35  ;;  %954 = vmatprep.subr.bf16.mxu1 %v2045_v63  ;;  %v2056_v35 = vld [vmem:[%s2765_s3 + $0xa0] ss:$8 sps:$4 sm:$0xff]  }
  0x3a   : > { %1299 = vmatprep.subr.bf16.mxu0 %v2065_v41  ;;  %v2096_v63 = vld [vmem:[%s2767_s5 + $0xc0] ss:$8 sps:$4 sm:$0xff]  }
  0x3c   : > { %602 = vmatmul.mubr.bf16.vlgmr.msra.gmra.mxu0 %v372_v44  ;;  %955 = vmatpush2.bf16.msra.mxu1 %v2047_v2  ;;  %v2071_v44 = vld [vmem:[%s2767_s5 + $0x54] ss:$8 sps:$4 sm:$0xff]   ;;  %v414_v2 = vlaneseq }
  0x3d   : > { %1800 = vmatprep.mubr.msk.bf16.mxu0 %vm544_vm0, %v375_v45  ;;  %956 = vmatprep.subr.bf16.mxu1 %v2048_v5  ;;  %v2069_v45 = vld [vmem:[%s2767_s5 + $0x50] ss:$8 sps:$4 sm:$0xff]  }
  0x3e   : > { %1300 = vmatpush1.bf16.msra.mxu0 %v2063_v40  ;;  %v415_v3 = vshrl.u32 %v414_v2, 7 }
  0x3f   : > { %1301 = vmatprep.subr.bf16.mxu0 %v2068_v42 }
  0x40   : > { %957 = vmatpush2.bf16.msra.mxu1 %v2050_v9  ;;  %v2487_v4 = vsub.s32 1, %v415_v3  ;;  %v2489_v5 = vsub.s32 0, %v415_v3 }
  0x41   : > { %958 = vmatprep.subr.bf16.mxu1 %v2051_v11 }
  0x42   : > { %1302 = vmatpush1.bf16.msra.mxu0 %v2066_v43  ;;  %v2498_v9 = vrot.slane %v412_v6, %v2489_v5 }
  0x43   : > { %1303 = vmatprep.subr.bf16.mxu0 %v2071_v44 }
  0x44   : > { %612 = vmatmul.mubr.bf16.gmra.mxu0 %v374_v54  ;;  %959 = vmatpush2.bf16.msra.mxu1 %v2053_v12  ;;  %v2086_v54 = vld [vmem:[%s2767_s5 + $0x4] ss:$8 sps:$4 sm:$0xff]  }
  0x45   : > { %1801 = vmatprep.mubr.msk.bf16.mxu0 %vm544_vm0, %v377_v55  ;;  %960 = vmatprep.subr.bf16.mxu1 %v2054_v34  ;;  %v2084_v55 = vld [vmem:[%s2767_s5] ss:$8 sps:$4 sm:$0xff]  }
  0x46   : > { %1304 = vmatpush1.bf16.msra.mxu0 %v2069_v45 }
  0x47   : > { %1305 = vmatprep.subr.bf16.mxu0 %v2074_v46 }
  0x48   : > { %961 = vmatpush2.bf16.msra.mxu1 %v2056_v35 }
  0x49   : > { %962 = vmatprep.subr.bf16.mxu1 %v2057_v36 }
  0x4a   : > { %1306 = vmatpush1.bf16.msra.mxu0 %v2072_v47 }
  0x4b   : > { %1307 = vmatprep.subr.bf16.mxu0 %v2077_v48 }
  0x4c   : > { %622 = vmatmul.mubr.bf16.gmra.mxu0 %v376_v0  ;;  %963 = vmatpush2.bf16.msra.mxu1 %v2059_v37  ;;  %v2101_v0 = vld [vmem:[%s2767_s5 + $0xb4] ss:$8 sps:$4 sm:$0xff]  }
  0x4d   : > { %1802 = vmatprep.mubr.msk.bf16.mxu0 %vm544_vm0, %v379_v1  ;;  %964 = vmatprep.subr.bf16.mxu1 %v2060_v38  ;;  %v2099_v1 = vld [vmem:[%s2767_s5 + $0xb0] ss:$8 sps:$4 sm:$0xff]  }
  0x4e   : > { %1308 = vmatpush1.bf16.msra.mxu0 %v2075_v49 }
  0x4f   : > { %1309 = vmatprep.subr.bf16.mxu0 %v2080_v50 }
  0x50   : > { %965 = vmatpush2.bf16.msra.mxu1 %v2062_v39 }
  0x52   : > { %1310 = vmatpush1.bf16.msra.mxu0 %v2078_v51 }
  0x53   : > { %1311 = vmatprep.subr.bf16.mxu0 %v2083_v52 }
  0x54   : > { %632 = vmatmul.mubr.bf16.gmra.mxu0 %v378_v8  ;;  %v2495_v8 = vrot.slane %v412_v6, %v2487_v4 }
  0x55   : > { %1803 = vmatprep.mubr.msk.bf16.mxu0 %vm544_vm0, %v381_v10 }
  0x56   : > { %1312 = vmatpush1.bf16.msra.mxu0 %v2081_v53 }
  0x57   : > { %1313 = vmatprep.subr.bf16.mxu0 %v2086_v54 }
  0x5a   : > { %1314 = vmatpush1.bf16.msra.mxu0 %v2084_v55 }
  0x5b   : > { %1315 = vmatprep.subr.bf16.mxu0 %v2089_v56 }
  0x5c   : > { %642 = vmatmul.mubr.bf16.gmra.mxu0 %v380_v17 }
  0x5d   : > { %1804 = vmatprep.mubr.msk.bf16.mxu0 %vm544_vm0, %v383_v18 }
  0x5e   : > { %1316 = vmatpush2.bf16.msra.mxu0 %v2087_v57 }
  0x5f   : > { %1317 = vmatprep.subr.bf16.mxu0 %v2092_v58 }
  0x62   : > { %1318 = vmatpush2.bf16.msra.mxu0 %v2090_v59 }
  0x63   : > { %1319 = vmatprep.subr.bf16.mxu0 %v2095_v60 }
  0x64   : > { %652 = vmatmul.mubr.bf16.gmra.mxu0 %v382_v23 }
  0x65   : > { %1805 = vmatprep.mubr.msk.bf16.mxu0 %vm544_vm0, %v385_v24 }
  0x66   : > { %1320 = vmatpush2.bf16.msra.mxu0 %v2093_v61 }
  0x67   : > { %1321 = vmatprep.subr.bf16.mxu0 %v2098_v62 }
  0x6a   : > { %1322 = vmatpush2.bf16.msra.mxu0 %v2096_v63 }
  0x6b   : > { %1323 = vmatprep.subr.bf16.mxu0 %v2101_v0 }
  0x6c   : > { %662 = vmatmul.mubr.bf16.gmra.mxu0 %v384_v29 }
  0x6d   : > { %1806 = vmatprep.mubr.msk.bf16.mxu0 %vm544_vm0, %v387_v30 }
  0x6e   : > { %1324 = vmatpush2.bf16.msra.mxu0 %v2099_v1 }
  0x74   : > { %672 = vmatmul.mubr.bf16.gmra.mxu0 %v386_v33 }
  0xfc   : > { %v603_v7 = vpop.f32.mrf.mxu0 }
  0xfd   : > { %v604_v14 = vadd.f32 %v603_v7, %v2498_v9 }
  0xfe   : > { %v605_v10 = vpop.f32.mrf.mxu0 }
  0xff   : > { %v606_v12 = vadd.f32 %v605_v10, %v2495_v8  ;;  %v682_v21 = vmax.f32 %v604_v14, 0.0 }
 0x100   : > { %v607_v11 = vpop.f32.mrf.mxu0 }
 0x101   : > { %v608_v13 = vadd.f32 %v607_v11, %v2498_v9  ;;  %v683_v19 = vmax.f32 %v606_v12, 0.0 }
 0x102   : > { %v609_v15 = vpop.f32.mrf.mxu0 }
 0x103   : > { %v610_v16 = vadd.f32 %v609_v15, %v2495_v8  ;;  %v684_v17 = vmax.f32 %v608_v13, 0.0 }
 0x104   : > { %v613_v18 = vpop.f32.mrf.mxu0 }
 0x105   : > { %v685_v20 = vmax.f32 %v610_v16, 0.0  ;;  %v714_v24 = vpack.c.bf16 %v684_v17, %v682_v21  ;;  %v614_v28 = vadd.f32 %v613_v18, %v2498_v9 }
 0x106   : > { %v615_v22 = vpop.f32.mrf.mxu0 }
 0x107   : > { %v715_v23 = vpack.c.bf16 %v685_v20, %v683_v19  ;;  %v616_v26 = vadd.f32 %v615_v22, %v2495_v8  ;;  %v686_v35 = vmax.f32 %v614_v28, 0.0 }
 0x108   : > { %v617_v25 = vpop.f32.mrf.mxu0 }
 0x109   : > { %v618_v27 = vadd.f32 %v617_v25, %v2498_v9  ;;  %966 = vmatprep.mubr.bf16.mxu1 %v715_v23  ;;  %v687_v33 = vmax.f32 %v616_v26, 0.0 }
 0x10a   : > { %v619_v29 = vpop.f32.mrf.mxu0  ;;  %967 = vmatmul.mubr.bf16.vlgmr.msra.gmra.mxu1 %v714_v24 }
 0x10b   : > { %v620_v30 = vadd.f32 %v619_v29, %v2495_v8  ;;  %v688_v31 = vmax.f32 %v618_v27, 0.0 }
 0x10c   : > { %v623_v32 = vpop.f32.mrf.mxu0 }
 0x10d   : > { %v689_v34 = vmax.f32 %v620_v30, 0.0  ;;  %v716_v38 = vpack.c.bf16 %v688_v31, %v686_v35  ;;  %v624_v42 = vadd.f32 %v623_v32, %v2498_v9 }
 0x10e   : > { %v625_v36 = vpop.f32.mrf.mxu0 }
 0x10f   : > { %v717_v37 = vpack.c.bf16 %v689_v34, %v687_v33  ;;  %v626_v40 = vadd.f32 %v625_v36, %v2495_v8  ;;  %v690_v49 = vmax.f32 %v624_v42, 0.0 }
 0x110   : > { %v627_v39 = vpop.f32.mrf.mxu0 }
 0x111   : > { %v628_v41 = vadd.f32 %v627_v39, %v2498_v9  ;;  %976 = vmatprep.mubr.bf16.mxu1 %v717_v37  ;;  %v691_v47 = vmax.f32 %v626_v40, 0.0 }
 0x112   : > { %v629_v43 = vpop.f32.mrf.mxu0  ;;  %977 = vmatmul.mubr.bf16.gmra.mxu1 %v716_v38 }
 0x113   : > { %v630_v44 = vadd.f32 %v629_v43, %v2495_v8  ;;  %v692_v45 = vmax.f32 %v628_v41, 0.0 }
 0x114   : > { %v633_v46 = vpop.f32.mrf.mxu0 }
 0x115   : > { %v693_v48 = vmax.f32 %v630_v44, 0.0  ;;  %v718_v52 = vpack.c.bf16 %v692_v45, %v690_v49  ;;  %v634_v56 = vadd.f32 %v633_v46, %v2498_v9 }
 0x116   : > { %v635_v50 = vpop.f32.mrf.mxu0 }
 0x117   : > { %v719_v51 = vpack.c.bf16 %v693_v48, %v691_v47  ;;  %v636_v54 = vadd.f32 %v635_v50, %v2495_v8  ;;  %v694_v63 = vmax.f32 %v634_v56, 0.0 }
 0x118   : > { %v637_v53 = vpop.f32.mrf.mxu0 }
 0x119   : > { %v638_v55 = vadd.f32 %v637_v53, %v2498_v9  ;;  %986 = vmatprep.mubr.bf16.mxu1 %v719_v51  ;;  %v695_v61 = vmax.f32 %v636_v54, 0.0 }
 0x11a   : > { %v639_v57 = vpop.f32.mrf.mxu0  ;;  %987 = vmatmul.mubr.bf16.gmra.mxu1 %v718_v52 }
 0x11b   : > { %v640_v58 = vadd.f32 %v639_v57, %v2495_v8  ;;  %v696_v59 = vmax.f32 %v638_v55, 0.0 }
 0x11c   : > { %v643_v60 = vpop.f32.mrf.mxu0 }
 0x11d   : > { %v697_v62 = vmax.f32 %v640_v58, 0.0  ;;  %v720_v2 = vpack.c.bf16 %v696_v59, %v694_v63  ;;  %v644_v10 = vadd.f32 %v643_v60, %v2498_v9  ;;  %v2110_v63 = vld [vmem:[%s2767_s5 + $0x84] ss:$8 sps:$4 sm:$0xff]  }
 0x11e   : > { %v645_v0 = vpop.f32.mrf.mxu0 }
 0x11f   : > { %v721_v1 = vpack.c.bf16 %v697_v62, %v695_v61  ;;  %v646_v6 = vadd.f32 %v645_v0, %v2495_v8  ;;  %v698_v17 = vmax.f32 %v644_v10, 0.0  ;;  %v2104_v61 = vld [vmem:[%s2767_s5 + $0xa4] ss:$8 sps:$4 sm:$0xff]   ;;  %v2105_v62 = vld [vmem:[%s2767_s5 + $0x90] ss:$8 sps:$4 sm:$0xff]  }
 0x120   : > { %v647_v3 = vpop.f32.mrf.mxu0  ;;  %1325 = vmatprep.subr.bf16.mxu0 %v2104_v61  ;;  %v2108_v0 = vld [vmem:[%s2767_s5 + $0x80] ss:$8 sps:$4 sm:$0xff]  }
 0x121   : > { %v648_v7 = vadd.f32 %v647_v3, %v2498_v9  ;;  %996 = vmatprep.mubr.bf16.mxu1 %v721_v1  ;;  %v699_v15 = vmax.f32 %v646_v6, 0.0  ;;  %v2111_v1 = vld [vmem:[%s2769_s7 + $0x78] sm:$0xff]   ;;  %v2113_v3 = vld [vmem:[%s2769_s7 + $0x70] sm:$0xff]   ;;  %v2116_v10 = vld [vmem:[%s2769_s7 + $0x28] sm:$0xff]  }
 0x122   : > { %v649_v11 = vpop.f32.mrf.mxu0  ;;  %997 = vmatmul.mubr.bf16.gmra.mxu1 %v720_v2  ;;  %v2112_v2 = vld [vmem:[%s2769_s7 + $0x38] sm:$0xff]   ;;  %1955 = vmatprep.subr.bf16.mxu1 %v2111_v1  ;;  %v2114_v6 = vld [vmem:[%s2769_s7 + $0x30] sm:$0xff]  }
 0x123   : > { %v650_v12 = vadd.f32 %v649_v11, %v2495_v8  ;;  %v700_v13 = vmax.f32 %v648_v7, 0.0  ;;  %1963 = vmatpush3.bf16.msra.mxu1 %v2112_v2  ;;  %v2115_v7 = vld [vmem:[%s2769_s7 + $0x68] sm:$0xff]   ;;  %v2117_v11 = vld [vmem:[%s2769_s7 + $0x60] sm:$0xff]  }
 0x124   : > { %v653_v14 = vpop.f32.mrf.mxu0  ;;  %1956 = vmatprep.subr.bf16.mxu1 %v2113_v3 }
 0x125   : > { %v701_v16 = vmax.f32 %v650_v12, 0.0  ;;  %v722_v20 = vpack.c.bf16 %v700_v13, %v698_v17  ;;  %v654_v24 = vadd.f32 %v653_v14, %v2498_v9  ;;  %v2574_v12 = vld [vmem:[%s2769_s7 + $0x20] sm:$0xff]   ;;  %v2579_v13 = vld [vmem:[%s2769_s7 + $0x58] sm:$0xff]  }
 0x126   : > { %v655_v18 = vpop.f32.mrf.mxu0  ;;  %v2586_v14 = vld [vmem:[%s2769_s7 + $0x18] sm:$0xff]   ;;  %v762_v17 = vld [vmem:[%s2766_s4] sm:$0x3] }
 0x127   : > { %v723_v19 = vpack.c.bf16 %v701_v16, %v699_v15  ;;  %v656_v22 = vadd.f32 %v655_v18, %v2495_v8  ;;  %v702_v31 = vmax.f32 %v654_v24, 0.0  ;;  %1964 = vmatpush3.bf16.msra.mxu1 %v2114_v6  ;;  %v2591_v15 = vld [vmem:[%s2769_s7 + $0x50] sm:$0xff]  }
 0x128   : > { %v657_v21 = vpop.f32.mrf.mxu0  ;;  %1957 = vmatprep.subr.bf16.mxu1 %v2115_v7  ;;  %v2598_v16 = vld [vmem:[%s2769_s7 + $0x10] sm:$0xff]  }
 0x129   : > { %v658_v23 = vadd.f32 %v657_v21, %v2498_v9  ;;  %1006 = vmatprep.mubr.bf16.mxu1 %v723_v19  ;;  %v703_v29 = vmax.f32 %v656_v22, 0.0  ;;  %v2605_v19 = vrot.slane %v762_v17, %v2487_v4 }
 0x12a   : > { %v659_v25 = vpop.f32.mrf.mxu0  ;;  %1007 = vmatmul.mubr.bf16.gmra.mxu1 %v722_v20  ;;  %v2608_v20 = vrot.slane %v762_v17, %v2489_v5 }
 0x12b   : > { %v660_v26 = vadd.f32 %v659_v25, %v2495_v8  ;;  %v704_v27 = vmax.f32 %v658_v23, 0.0  ;;  %1965 = vmatpush3.bf16.msra.mxu1 %v2116_v10 }
 0x12c   : > { %v663_v28 = vpop.f32.mrf.mxu0  ;;  %1958 = vmatprep.subr.bf16.mxu1 %v2117_v11 }
 0x12d   : > { %v705_v30 = vmax.f32 %v660_v26, 0.0  ;;  %v724_v34 = vpack.c.bf16 %v704_v27, %v702_v31  ;;  %v664_v38 = vadd.f32 %v663_v28, %v2498_v9 }
 0x12e   : > { %v665_v32 = vpop.f32.mrf.mxu0 }
 0x12f   : > { %v725_v33 = vpack.c.bf16 %v705_v30, %v703_v29  ;;  %v666_v36 = vadd.f32 %v665_v32, %v2495_v8  ;;  %v706_v45 = vmax.f32 %v664_v38, 0.0  ;;  %1966 = vmatpush3.bf16.msra.mxu1 %v2574_v12 }
 0x130   : > { %v667_v35 = vpop.f32.mrf.mxu0  ;;  %1959 = vmatprep.subr.bf16.mxu1 %v2579_v13 }
 0x131   : > { %v668_v37 = vadd.f32 %v667_v35, %v2498_v9  ;;  %1016 = vmatprep.mubr.bf16.mxu1 %v725_v33  ;;  %v707_v43 = vmax.f32 %v666_v36, 0.0 }
 0x132   : > { %v669_v39 = vpop.f32.mrf.mxu0  ;;  %1017 = vmatmul.mubr.bf16.gmra.mxu1 %v724_v34 }
 0x133   : > { %v670_v40 = vadd.f32 %v669_v39, %v2495_v8  ;;  %v708_v41 = vmax.f32 %v668_v37, 0.0  ;;  %1967 = vmatpush3.bf16.msra.mxu1 %v2586_v14 }
 0x134   : > { %v673_v42 = vpop.f32.mrf.mxu0  ;;  %1960 = vmatprep.subr.bf16.mxu1 %v2591_v15 }
 0x135   : > { %v709_v44 = vmax.f32 %v670_v40, 0.0  ;;  %v726_v48 = vpack.c.bf16 %v708_v41, %v706_v45  ;;  %v674_v52 = vadd.f32 %v673_v42, %v2498_v9 }
 0x136   : > { %v675_v46 = vpop.f32.mrf.mxu0 }
 0x137   : > { %v727_v47 = vpack.c.bf16 %v709_v44, %v707_v43  ;;  %v676_v50 = vadd.f32 %v675_v46, %v2495_v8  ;;  %v710_v58 = vmax.f32 %v674_v52, 0.0  ;;  %1968 = vmatpush3.bf16.msra.mxu1 %v2598_v16 }
 0x138   : > { %v677_v49 = vpop.f32.mrf.mxu0 }
 0x139   : > { %v678_v51 = vadd.f32 %v677_v49, %v2498_v9  ;;  %1026 = vmatprep.mubr.bf16.mxu1 %v727_v47  ;;  %v711_v56 = vmax.f32 %v676_v50, 0.0  ;;  %v2102_v9 = vld [vmem:[%s2767_s5 + $0xa0] ss:$8 sps:$4 sm:$0xff]  }
 0x13a   : > { %v679_v53 = vpop.f32.mrf.mxu0  ;;  %1027 = vmatmul.mubr.bf16.gmra.mxu1 %v726_v48  ;;  %1326 = vmatpush2.bf16.msra.mxu0 %v2102_v9 }
 0x13b   : > { %v680_v54 = vadd.f32 %v679_v53, %v2495_v8  ;;  %v712_v55 = vmax.f32 %v678_v51, 0.0  ;;  %v2107_v8 = vld [vmem:[%s2767_s5 + $0x94] ss:$8 sps:$4 sm:$0xff]  }
 0x13c   : > { %1327 = vmatprep.subr.bf16.mxu0 %v2107_v8 }
 0x13d   : > { %v713_v57 = vmax.f32 %v680_v54, 0.0  ;;  %v728_v60 = vpack.c.bf16 %v712_v55, %v710_v58 }
 0x13e   : > { %1328 = vmatpush2.bf16.msra.mxu0 %v2105_v62 }
 0x13f   : > { %v729_v59 = vpack.c.bf16 %v713_v57, %v711_v56  ;;  %1329 = vmatprep.subr.bf16.mxu0 %v2110_v63 }
 0x141   : > { %1036 = vmatprep.mubr.bf16.mxu1 %v729_v59 }
 0x142   : > { %1037 = vmatmul.mubr.bf16.gmra.mxu1 %v728_v60  ;;  %1330 = vmatpush2.bf16.msra.mxu0 %v2108_v0 }
 0x143   : > { %1891 = vmatprep.subr.bf16.mxu0 %v2111_v1 }
 0x1ca   : > { %v968_v18 = vpop.f32.mrf.mxu1 }
 0x1cb   : > { %v969_v25 = vadd.f32 %v968_v18, %v2608_v20 }
 0x1cc   : > { %v970_v21 = vpop.f32.mrf.mxu1 }
 0x1cd   : > { %v971_v23 = vadd.f32 %v970_v21, %v2605_v19  ;;  %v1047_v32 = vmax.f32 %v969_v25, 0.0 }
 0x1ce   : > { %v972_v22 = vpop.f32.mrf.mxu1 }
 0x1cf   : > { %v973_v24 = vadd.f32 %v972_v22, %v2608_v20  ;;  %v1048_v30 = vmax.f32 %v971_v23, 0.0 }
 0x1d0   : > { %v974_v26 = vpop.f32.mrf.mxu1 }
 0x1d1   : > { %v975_v27 = vadd.f32 %v974_v26, %v2605_v19  ;;  %v1049_v28 = vmax.f32 %v973_v24, 0.0 }
 0x1d2   : > { %v978_v29 = vpop.f32.mrf.mxu1 }
 0x1d3   : > { %v1050_v31 = vmax.f32 %v975_v27, 0.0  ;;  %v1079_v35 = vpack.c.bf16 %v1049_v28, %v1047_v32  ;;  %v979_v39 = vadd.f32 %v978_v29, %v2608_v20 }
 0x1d4   : > { %v980_v33 = vpop.f32.mrf.mxu1 }
 0x1d5   : > { %v1080_v34 = vpack.c.bf16 %v1050_v31, %v1048_v30  ;;  %v981_v37 = vadd.f32 %v980_v33, %v2605_v19  ;;  %v1051_v46 = vmax.f32 %v979_v39, 0.0 }
 0x1d6   : > { %v982_v36 = vpop.f32.mrf.mxu1 }
 0x1d7   : > { %v983_v38 = vadd.f32 %v982_v36, %v2608_v20  ;;  %1331 = vmatprep.mubr.bf16.mxu0 %v1080_v34  ;;  %v1052_v44 = vmax.f32 %v981_v37, 0.0 }
 0x1d8   : > { %v984_v40 = vpop.f32.mrf.mxu1  ;;  %1332 = vmatmul.mubr.bf16.vlgmr.msra.gmra.mxu0 %v1079_v35 }
 0x1d9   : > { %v985_v41 = vadd.f32 %v984_v40, %v2605_v19  ;;  %1892 = vmatpush3.bf16.msra.mxu0 %v2112_v2  ;;  %v1053_v42 = vmax.f32 %v983_v38, 0.0 }
 0x1da   : > { %v988_v43 = vpop.f32.mrf.mxu1  ;;  %1893 = vmatprep.subr.bf16.mxu0 %v2113_v3 }
 0x1db   : > { %v1054_v45 = vmax.f32 %v985_v41, 0.0  ;;  %v1081_v49 = vpack.c.bf16 %v1053_v42, %v1051_v46  ;;  %v989_v53 = vadd.f32 %v988_v43, %v2608_v20 }
 0x1dc   : > { %v990_v47 = vpop.f32.mrf.mxu1 }
 0x1dd   : > { %v1082_v48 = vpack.c.bf16 %v1054_v45, %v1052_v44  ;;  %1894 = vmatpush3.bf16.msra.mxu0 %v2114_v6  ;;  %v991_v51 = vadd.f32 %v990_v47, %v2605_v19  ;;  %v1055_v60 = vmax.f32 %v989_v53, 0.0 }
 0x1de   : > { %v992_v50 = vpop.f32.mrf.mxu1  ;;  %1895 = vmatprep.subr.bf16.mxu0 %v2115_v7 }
 0x1df   : > { %v993_v52 = vadd.f32 %v992_v50, %v2608_v20  ;;  %1341 = vmatprep.mubr.bf16.mxu0 %v1082_v48  ;;  %v1056_v58 = vmax.f32 %v991_v51, 0.0 }
 0x1e0   : > { %v994_v54 = vpop.f32.mrf.mxu1  ;;  %1342 = vmatmul.mubr.bf16.gmra.mxu0 %v1081_v49 }
 0x1e1   : > { %v995_v55 = vadd.f32 %v994_v54, %v2605_v19  ;;  %1896 = vmatpush3.bf16.msra.mxu0 %v2116_v10  ;;  %v1057_v56 = vmax.f32 %v993_v52, 0.0 }
 0x1e2   : > { %v998_v57 = vpop.f32.mrf.mxu1  ;;  %1897 = vmatprep.subr.bf16.mxu0 %v2117_v11 }
 0x1e3   : > { %v1058_v59 = vmax.f32 %v995_v55, 0.0  ;;  %v1083_v8 = vpack.c.bf16 %v1057_v56, %v1055_v60  ;;  %v999_v1 = vadd.f32 %v998_v57, %v2608_v20 }
 0x1e4   : > { %v1000_v61 = vpop.f32.mrf.mxu1 }
 0x1e5   : > { %v1084_v9 = vpack.c.bf16 %v1058_v59, %v1056_v58  ;;  %1898 = vmatpush3.bf16.msra.mxu0 %v2574_v12  ;;  %v1001_v63 = vadd.f32 %v1000_v61, %v2605_v19  ;;  %v1059_v12 = vmax.f32 %v999_v1, 0.0 }
 0x1e6   : > { %v1002_v62 = vpop.f32.mrf.mxu1  ;;  %1899 = vmatprep.subr.bf16.mxu0 %v2579_v13 }
 0x1e7   : > { %v1003_v0 = vadd.f32 %v1002_v62, %v2608_v20  ;;  %1351 = vmatprep.mubr.bf16.mxu0 %v1084_v9  ;;  %v1060_v10 = vmax.f32 %v1001_v63, 0.0 }
 0x1e8   : > { %v1004_v2 = vpop.f32.mrf.mxu1  ;;  %1352 = vmatmul.mubr.bf16.gmra.mxu0 %v1083_v8 }
 0x1e9   : > { %v1005_v3 = vadd.f32 %v1004_v2, %v2605_v19  ;;  %1900 = vmatpush3.bf16.msra.mxu0 %v2586_v14  ;;  %v1061_v6 = vmax.f32 %v1003_v0, 0.0 }
 0x1ea   : > { %v1008_v7 = vpop.f32.mrf.mxu1  ;;  %1901 = vmatprep.subr.bf16.mxu0 %v2591_v15 }
 0x1eb   : > { %v1062_v11 = vmax.f32 %v1005_v3, 0.0  ;;  %v1085_v18 = vpack.c.bf16 %v1061_v6, %v1059_v12  ;;  %v1009_v14 = vadd.f32 %v1008_v7, %v2608_v20  ;;  %v1127_v12 = vld [vmem:[%s2768_s6] sm:$0x3] }
 0x1ec   : > { %v1010_v13 = vpop.f32.mrf.mxu1 }
 0x1ed   : > { %v1086_v17 = vpack.c.bf16 %v1062_v11, %v1060_v10  ;;  %1902 = vmatpush3.bf16.msra.mxu0 %v2598_v16  ;;  %v1011_v22 = vadd.f32 %v1010_v13, %v2605_v19  ;;  %v1063_v29 = vmax.f32 %v1009_v14, 0.0  ;;  %v2123_v10 = vld [vmem:[%s2769_s7 + $0x48] sm:$0xff]   ;;  %v2126_v11 = vld [vmem:[%s2769_s7] sm:$0xff]  }
 0x1ee   : > { %v1012_v21 = vpop.f32.mrf.mxu1  ;;  %1961 = vmatprep.subr.bf16.mxu1 %v2123_v10  ;;  %1903 = vmatprep.subr.bf16.mxu0 %v2123_v10 }
 0x1ef   : > { %v1013_v23 = vadd.f32 %v1012_v21, %v2608_v20  ;;  %1361 = vmatprep.mubr.bf16.mxu0 %v1086_v17  ;;  %v1064_v27 = vmax.f32 %v1011_v22, 0.0  ;;  %v2663_v17 = vrot.slane %v1127_v12, %v2487_v4 }
 0x1f0   : > { %v1014_v24 = vpop.f32.mrf.mxu1  ;;  %1362 = vmatmul.mubr.bf16.gmra.mxu0 %v1085_v18  ;;  %v2666_v18 = vrot.slane %v1127_v12, %v2489_v5 }
 0x1f1   : > { %v1015_v15 = vadd.f32 %v1014_v24, %v2605_v19  ;;  %v1065_v25 = vmax.f32 %v1013_v23, 0.0 }
 0x1f2   : > { %v1018_v26 = vpop.f32.mrf.mxu1 }
 0x1f3   : > { %v1066_v28 = vmax.f32 %v1015_v15, 0.0  ;;  %v1087_v31 = vpack.c.bf16 %v1065_v25, %v1063_v29  ;;  %v1019_v35 = vadd.f32 %v1018_v26, %v2608_v20 }
 0x1f4   : > { %v1020_v30 = vpop.f32.mrf.mxu1 }
 0x1f5   : > { %v1088_v16 = vpack.c.bf16 %v1066_v28, %v1064_v27  ;;  %v1021_v33 = vadd.f32 %v1020_v30, %v2605_v19  ;;  %v1067_v42 = vmax.f32 %v1019_v35, 0.0 }
 0x1f6   : > { %v1022_v32 = vpop.f32.mrf.mxu1 }
 0x1f7   : > { %v1023_v34 = vadd.f32 %v1022_v32, %v2608_v20  ;;  %1371 = vmatprep.mubr.bf16.mxu0 %v1088_v16  ;;  %v1068_v40 = vmax.f32 %v1021_v33, 0.0 }
 0x1f8   : > { %v1024_v36 = vpop.f32.mrf.mxu1  ;;  %1372 = vmatmul.mubr.bf16.gmra.mxu0 %v1087_v31 }
 0x1f9   : > { %v1025_v37 = vadd.f32 %v1024_v36, %v2605_v19  ;;  %v1069_v38 = vmax.f32 %v1023_v34, 0.0 }
 0x1fa   : > { %v1028_v39 = vpop.f32.mrf.mxu1 }
 0x1fb   : > { %v1070_v41 = vmax.f32 %v1025_v37, 0.0  ;;  %v1089_v45 = vpack.c.bf16 %v1069_v38, %v1067_v42  ;;  %v1029_v49 = vadd.f32 %v1028_v39, %v2608_v20 }
 0x1fc   : > { %v1030_v43 = vpop.f32.mrf.mxu1 }
 0x1fd   : > { %v1090_v44 = vpack.c.bf16 %v1070_v41, %v1068_v40  ;;  %v1031_v47 = vadd.f32 %v1030_v43, %v2605_v19  ;;  %v1071_v56 = vmax.f32 %v1029_v49, 0.0 }
 0x1fe   : > { %v1032_v46 = vpop.f32.mrf.mxu1 }
 0x1ff   : > { %v1033_v48 = vadd.f32 %v1032_v46, %v2608_v20  ;;  %1381 = vmatprep.mubr.bf16.mxu0 %v1090_v44  ;;  %v1072_v54 = vmax.f32 %v1031_v47, 0.0 }
 0x200   : > { %v1034_v50 = vpop.f32.mrf.mxu1  ;;  %1382 = vmatmul.mubr.bf16.gmra.mxu0 %v1089_v45 }
 0x201   : > { %v1035_v51 = vadd.f32 %v1034_v50, %v2605_v19  ;;  %v1073_v52 = vmax.f32 %v1033_v48, 0.0 }
 0x202   : > { %v1038_v53 = vpop.f32.mrf.mxu1 }
 0x203   : > { %v1074_v55 = vmax.f32 %v1035_v51, 0.0  ;;  %v1091_v59 = vpack.c.bf16 %v1073_v52, %v1071_v56  ;;  %v1039_v8 = vadd.f32 %v1038_v53, %v2608_v20 }
 0x204   : > { %v1040_v57 = vpop.f32.mrf.mxu1 }
 0x205   : > { %v1092_v58 = vpack.c.bf16 %v1074_v55, %v1072_v54  ;;  %v1041_v61 = vadd.f32 %v1040_v57, %v2605_v19  ;;  %v1075_v3 = vmax.f32 %v1039_v8, 0.0 }
 0x206   : > { %v1042_v60 = vpop.f32.mrf.mxu1 }
 0x207   : > { %v1043_v9 = vadd.f32 %v1042_v60, %v2608_v20  ;;  %1391 = vmatprep.mubr.bf16.mxu0 %v1092_v58  ;;  %v1076_v1 = vmax.f32 %v1041_v61, 0.0  ;;  %v2124_v20 = vld [vmem:[%s2769_s7 + $0x8] sm:$0xff]  }
 0x208   : > { %v1044_v62 = vpop.f32.mrf.mxu1  ;;  %1392 = vmatmul.mubr.bf16.gmra.mxu0 %v1091_v59  ;;  %1969 = vmatpush3.bf16.msra.mxu1 %v2124_v20 }
 0x209   : > { %v1045_v63 = vadd.f32 %v1044_v62, %v2605_v19  ;;  %v1077_v0 = vmax.f32 %v1043_v9, 0.0  ;;  %1904 = vmatpush3.bf16.msra.mxu0 %v2124_v20  ;;  %v2125_v19 = vld [vmem:[%s2769_s7 + $0x40] sm:$0xff]  }
 0x20a   : > { %1905 = vmatprep.subr.bf16.mxu0 %v2125_v19  ;;  %1962 = vmatprep.subr.bf16.mxu1 %v2125_v19 }
 0x20b   : > { %v1078_v2 = vmax.f32 %v1045_v63, 0.0  ;;  %v1093_v7 = vpack.c.bf16 %v1077_v0, %v1075_v3 }
 0x20c   : > { %1970 = vmatpush3.bf16.msra.mxu1 %v2126_v11 }
 0x20d   : > { %v1094_v6 = vpack.c.bf16 %v1078_v2, %v1076_v1  ;;  %1906 = vmatpush3.bf16.msra.mxu0 %v2126_v11 }
 0x20f   : > { %1401 = vmatprep.mubr.bf16.mxu0 %v1094_v6 }
 0x210   : > { %1402 = vmatmul.mubr.bf16.gmra.mxu0 %v1093_v7 }
 0x298   : > { %v1333_v13 = vpop.f32.mrf.mxu0 }
 0x299   : > { %v1334_v24 = vadd.f32 %v1333_v13, %v2666_v18 }
 0x29a   : > { %v1335_v21 = vpop.f32.mrf.mxu0 }
 0x29b   : > { %v1336_v23 = vadd.f32 %v1335_v21, %v2663_v17  ;;  %v1412_v4 = vmax.f32 %v1334_v24, 0.0 }
 0x29c   : > { %v1337_v22 = vpop.f32.mrf.mxu0 }
 0x29d   : > { %v1338_v14 = vadd.f32 %v1337_v22, %v2666_v18  ;;  %v1413_v28 = vmax.f32 %v1336_v23, 0.0 }
 0x29e   : > { %v1339_v15 = vpop.f32.mrf.mxu0 }
 0x29f   : > { %v1340_v25 = vadd.f32 %v1339_v15, %v2663_v17  ;;  %v1414_v26 = vmax.f32 %v1338_v14, 0.0 }
 0x2a0   : > { %v1343_v27 = vpop.f32.mrf.mxu0 }
 0x2a1   : > { %v1415_v29 = vmax.f32 %v1340_v25, 0.0  ;;  %v1444_v5 = vpack.c.bf16 %v1414_v26, %v1412_v4  ;;  %v1344_v34 = vadd.f32 %v1343_v27, %v2666_v18 }
 0x2a2   : > { %v1345_v30 = vpop.f32.mrf.mxu0 }
 0x2a3   : > { %v1445_v16 = vpack.c.bf16 %v1415_v29, %v1413_v28  ;;  %v1346_v32 = vadd.f32 %v1345_v30, %v2663_v17  ;;  %v1416_v41 = vmax.f32 %v1344_v34, 0.0 }
 0x2a4   : > { %v1347_v31 = vpop.f32.mrf.mxu0 }
 0x2a5   : > { %v1348_v33 = vadd.f32 %v1347_v31, %v2666_v18  ;;  %1627 = vmatprep.mubr.bf16.mxu0 %v1445_v16  ;;  %v1417_v39 = vmax.f32 %v1346_v32, 0.0 }
 0x2a6   : > { %v1349_v35 = vpop.f32.mrf.mxu0  ;;  %1628 = vmatmul.mubr.bf16.vlgmr.msra.gmra.mxu0 %v1444_v5 }
 0x2a7   : > { %v1350_v36 = vadd.f32 %v1349_v35, %v2663_v17  ;;  %v1418_v37 = vmax.f32 %v1348_v33, 0.0 }
 0x2a8   : > { %v1353_v38 = vpop.f32.mrf.mxu0 }
 0x2a9   : > { %v1419_v40 = vmax.f32 %v1350_v36, 0.0  ;;  %v1446_v44 = vpack.c.bf16 %v1418_v37, %v1416_v41  ;;  %v1354_v48 = vadd.f32 %v1353_v38, %v2666_v18 }
 0x2aa   : > { %v1355_v42 = vpop.f32.mrf.mxu0 }
 0x2ab   : > { %v1447_v43 = vpack.c.bf16 %v1419_v40, %v1417_v39  ;;  %v1356_v46 = vadd.f32 %v1355_v42, %v2663_v17  ;;  %v1420_v55 = vmax.f32 %v1354_v48, 0.0 }
 0x2ac   : > { %v1357_v45 = vpop.f32.mrf.mxu0 }
 0x2ad   : > { %v1358_v47 = vadd.f32 %v1357_v45, %v2666_v18  ;;  %1635 = vmatprep.mubr.bf16.mxu1 %v1447_v43  ;;  %v1421_v53 = vmax.f32 %v1356_v46, 0.0 }
 0x2ae   : > { %v1359_v49 = vpop.f32.mrf.mxu0  ;;  %1636 = vmatmul.mubr.bf16.vlgmr.msra.gmra.mxu1 %v1446_v44 }
 0x2af   : > { %v1360_v50 = vadd.f32 %v1359_v49, %v2663_v17  ;;  %v1422_v51 = vmax.f32 %v1358_v47, 0.0 }
 0x2b0   : > { %v1363_v52 = vpop.f32.mrf.mxu0 }
 0x2b1   : > { %v1423_v54 = vmax.f32 %v1360_v50, 0.0  ;;  %v1448_v58 = vpack.c.bf16 %v1422_v51, %v1420_v55  ;;  %v1364_v9 = vadd.f32 %v1363_v52, %v2666_v18 }
 0x2b2   : > { %v1365_v56 = vpop.f32.mrf.mxu0 }
 0x2b3   : > { %v1449_v57 = vpack.c.bf16 %v1423_v54, %v1421_v53  ;;  %v1366_v60 = vadd.f32 %v1365_v56, %v2663_v17  ;;  %v1424_v3 = vmax.f32 %v1364_v9, 0.0 }
 0x2b4   : > { %v1367_v59 = vpop.f32.mrf.mxu0 }
 0x2b5   : > { %v1368_v61 = vadd.f32 %v1367_v59, %v2666_v18  ;;  %1643 = vmatprep.mubr.bf16.mxu1 %v1449_v57  ;;  %v1425_v1 = vmax.f32 %v1366_v60, 0.0 }
 0x2b6   : > { %v1369_v8 = vpop.f32.mrf.mxu0  ;;  %1644 = vmatmul.mubr.bf16.gmra.mxu1 %v1448_v58 }
 0x2b7   : > { %v1370_v62 = vadd.f32 %v1369_v8, %v2663_v17  ;;  %v1426_v63 = vmax.f32 %v1368_v61, 0.0 }
 0x2b8   : > { %v1373_v0 = vpop.f32.mrf.mxu0 }
 0x2b9   : > { %v1427_v2 = vmax.f32 %v1370_v62, 0.0  ;;  %v1450_v10 = vpack.c.bf16 %v1426_v63, %v1424_v3  ;;  %v1374_v12 = vadd.f32 %v1373_v0, %v2666_v18  ;;  %v2704_v0 = vld [vmem:[%s2770_s8] ss:$0 sm:$0xff] }
 0x2ba   : > { %v1375_v6 = vpop.f32.mrf.mxu0 }
 0x2bb   : > { %v1451_v7 = vpack.c.bf16 %v1427_v2, %v1425_v1  ;;  %v1376_v19 = vadd.f32 %v1375_v6, %v2663_v17  ;;  %v1428_v15 = vmax.f32 %v1374_v12, 0.0 }
 0x2bc   : > { %v1377_v20 = vpop.f32.mrf.mxu0 }
 0x2bd   : > { %v1378_v11 = vadd.f32 %v1377_v20, %v2666_v18  ;;  %1651 = vmatprep.mubr.bf16.mxu1 %v1451_v7  ;;  %v1429_v14 = vmax.f32 %v1376_v19, 0.0 }
 0x2be   : > { %v1379_v13 = vpop.f32.mrf.mxu0  ;;  %1652 = vmatmul.mubr.bf16.gmra.mxu1 %v1450_v10 }
 0x2bf   : > { %v1380_v21 = vadd.f32 %v1379_v13, %v2663_v17  ;;  %v1430_v22 = vmax.f32 %v1378_v11, 0.0 }
 0x2c0   : > { %v1383_v23 = vpop.f32.mrf.mxu0 }
 0x2c1   : > { %v1431_v24 = vmax.f32 %v1380_v21, 0.0  ;;  %v1452_v27 = vpack.c.bf16 %v1430_v22, %v1428_v15  ;;  %v1384_v30 = vadd.f32 %v1383_v23, %v2666_v18 }
 0x2c2   : > { %v1385_v25 = vpop.f32.mrf.mxu0 }
 0x2c3   : > { %v1453_v26 = vpack.c.bf16 %v1431_v24, %v1429_v14  ;;  %v1386_v29 = vadd.f32 %v1385_v25, %v2663_v17  ;;  %v1432_v35 = vmax.f32 %v1384_v30, 0.0 }
 0x2c4   : > { %v1387_v28 = vpop.f32.mrf.mxu0 }
 0x2c5   : > { %v1388_v4 = vadd.f32 %v1387_v28, %v2666_v18  ;;  %1659 = vmatprep.mubr.bf16.mxu1 %v1453_v26  ;;  %v1433_v33 = vmax.f32 %v1386_v29, 0.0 }
 0x2c6   : > { %v1389_v16 = vpop.f32.mrf.mxu0  ;;  %1660 = vmatmul.mubr.bf16.gmra.mxu1 %v1452_v27 }
 0x2c7   : > { %v1390_v5 = vadd.f32 %v1389_v16, %v2663_v17  ;;  %v1434_v31 = vmax.f32 %v1388_v4, 0.0 }
 0x2c8   : > { %v1393_v32 = vpop.f32.mrf.mxu0 }
 0x2c9   : > { %v1435_v34 = vmax.f32 %v1390_v5, 0.0  ;;  %v1454_v38 = vpack.c.bf16 %v1434_v31, %v1432_v35  ;;  %v1394_v42 = vadd.f32 %v1393_v32, %v2666_v18 }
 0x2ca   : > { %v1395_v36 = vpop.f32.mrf.mxu0 }
 0x2cb   : > { %v1455_v37 = vpack.c.bf16 %v1435_v34, %v1433_v33  ;;  %v1396_v40 = vadd.f32 %v1395_v36, %v2663_v17  ;;  %v1436_v49 = vmax.f32 %v1394_v42, 0.0 }
 0x2cc   : > { %v1397_v39 = vpop.f32.mrf.mxu0 }
 0x2cd   : > { %v1398_v41 = vadd.f32 %v1397_v39, %v2666_v18  ;;  %1667 = vmatprep.mubr.bf16.mxu1 %v1455_v37  ;;  %v1437_v47 = vmax.f32 %v1396_v40, 0.0 }
 0x2ce   : > { %v1399_v43 = vpop.f32.mrf.mxu0  ;;  %1668 = vmatmul.mubr.bf16.gmra.mxu1 %v1454_v38 }
 0x2cf   : > { %v1400_v44 = vadd.f32 %v1399_v43, %v2663_v17  ;;  %v1438_v45 = vmax.f32 %v1398_v41, 0.0 }
 0x2d0   : > { %v1403_v46 = vpop.f32.mrf.mxu0 }
 0x2d1   : > { %v1439_v48 = vmax.f32 %v1400_v44, 0.0  ;;  %v1456_v52 = vpack.c.bf16 %v1438_v45, %v1436_v49  ;;  %v1404_v56 = vadd.f32 %v1403_v46, %v2666_v18 }
 0x2d2   : > { %v1405_v50 = vpop.f32.mrf.mxu0 }
 0x2d3   : > { %v1457_v51 = vpack.c.bf16 %v1439_v48, %v1437_v47  ;;  %v1406_v54 = vadd.f32 %v1405_v50, %v2663_v17  ;;  %v1440_v9 = vmax.f32 %v1404_v56, 0.0 }
 0x2d4   : > { %v1407_v53 = vpop.f32.mrf.mxu0 }
 0x2d5   : > { %v1408_v55 = vadd.f32 %v1407_v53, %v2666_v18  ;;  %1675 = vmatprep.mubr.bf16.mxu1 %v1457_v51  ;;  %v1441_v60 = vmax.f32 %v1406_v54, 0.0 }
 0x2d6   : > { %v1409_v57 = vpop.f32.mrf.mxu0  ;;  %1676 = vmatmul.mubr.bf16.gmra.mxu1 %v1456_v52 }
 0x2d7   : > { %v1410_v58 = vadd.f32 %v1409_v57, %v2663_v17  ;;  %v1442_v59 = vmax.f32 %v1408_v55, 0.0 }
 0x2d9   : > { %v1443_v61 = vmax.f32 %v1410_v58, 0.0  ;;  %v1458_v62 = vpack.c.bf16 %v1442_v59, %v1440_v9 }
 0x2db   : > { %v1459_v8 = vpack.c.bf16 %v1443_v61, %v1441_v60 }
 0x2dd   : > { %1683 = vmatprep.mubr.bf16.mxu1 %v1459_v8 }
 0x2de   : > { %1684 = vmatmul.mubr.bf16.gmra.mxu1 %v1458_v62 }
 0x366   : > { %v1907_v63 = vpop.f32.mrf.mxu0 }
 0x368   : > { %v1908_v18 = vpop.f32.mrf.mxu0 }
 0x369   : > { %v1909_v1 = vadd.f32 %v1908_v18, %v1907_v63 }
 0x36a   : > { %v1910_v17 = vpop.f32.mrf.mxu0 }
 0x36b   : > { %v1630_v2 = vadd.f32 %v1909_v1, %v2704_v0 }
 0x36c   : > { %v1911_v3 = vpop.f32.mrf.mxu0 }
 0x36d   : > { %1693 = vst.msk [vmem:[%s2709_s10] sm:$0xff] %vm1692_vm1, %v1630_v2  ;;  %v1912_v6 = vadd.f32 %v1911_v3, %v1910_v17 }
 0x36e   : > { %v1913_v7 = vpop.f32.mrf.mxu1 }
 0x36f   : > { %v1633_v10 = vadd.f32 %v1912_v6, %v2704_v0 }
 0x370   : > { %v1914_v20 = vpop.f32.mrf.mxu1 }
 0x371   : > { %1694 = vst.msk [vmem:[%s2709_s10 + $0x8] sm:$0xff] %vm1692_vm1, %v1633_v10  ;;  %v1915_v19 = vadd.f32 %v1914_v20, %v1913_v7 }
 0x372   : > { %v1916_v11 = vpop.f32.mrf.mxu1 }
 0x373   : > { %v1638_v12 = vadd.f32 %v1915_v19, %v2704_v0 }
 0x374   : > { %v1917_v13 = vpop.f32.mrf.mxu1 }
 0x375   : > { %1695 = vst.msk [vmem:[%s2709_s10 + $0x10] sm:$0xff] %vm1692_vm1, %v1638_v12  ;;  %v1918_v21 = vadd.f32 %v1917_v13, %v1916_v11 }
 0x376   : > { %v1919_v22 = vpop.f32.mrf.mxu1 }
 0x377   : > { %v1641_v23 = vadd.f32 %v1918_v21, %v2704_v0 }
 0x378   : > { %v1920_v14 = vpop.f32.mrf.mxu1 }
 0x379   : > { %1696 = vst.msk [vmem:[%s2709_s10 + $0x18] sm:$0xff] %vm1692_vm1, %v1641_v23  ;;  %v1921_v24 = vadd.f32 %v1920_v14, %v1919_v22 }
 0x37a   : > { %v1922_v15 = vpop.f32.mrf.mxu1 }
 0x37b   : > { %v1646_v25 = vadd.f32 %v1921_v24, %v2704_v0 }
 0x37c   : > { %v1923_v26 = vpop.f32.mrf.mxu1 }
 0x37d   : > { %1697 = vst.msk [vmem:[%s2709_s10 + $0x20] sm:$0xff] %vm1692_vm1, %v1646_v25  ;;  %v1924_v27 = vadd.f32 %v1923_v26, %v1922_v15 }
 0x37e   : > { %v1925_v28 = vpop.f32.mrf.mxu1 }
 0x37f   : > { %v1649_v29 = vadd.f32 %v1924_v27, %v2704_v0 }
 0x380   : > { %v1926_v4 = vpop.f32.mrf.mxu1 }
 0x381   : > { %1698 = vst.msk [vmem:[%s2709_s10 + $0x28] sm:$0xff] %vm1692_vm1, %v1649_v29  ;;  %v1927_v30 = vadd.f32 %v1926_v4, %v1925_v28 }
 0x382   : > { %v1928_v16 = vpop.f32.mrf.mxu1 }
 0x383   : > { %v1654_v5 = vadd.f32 %v1927_v30, %v2704_v0 }
 0x384   : > { %v1929_v31 = vpop.f32.mrf.mxu1 }
 0x385   : > { %1699 = vst.msk [vmem:[%s2709_s10 + $0x30] sm:$0xff] %vm1692_vm1, %v1654_v5  ;;  %v1930_v32 = vadd.f32 %v1929_v31, %v1928_v16 }
 0x386   : > { %v1931_v33 = vpop.f32.mrf.mxu1 }
 0x387   : > { %v1657_v34 = vadd.f32 %v1930_v32, %v2704_v0 }
 0x388   : > { %v1932_v35 = vpop.f32.mrf.mxu1 }
 0x389   : > { %1700 = vst.msk [vmem:[%s2709_s10 + $0x38] sm:$0xff] %vm1692_vm1, %v1657_v34  ;;  %v1933_v36 = vadd.f32 %v1932_v35, %v1931_v33 }
 0x38a   : > { %v1934_v37 = vpop.f32.mrf.mxu1 }
 0x38b   : > { %v1662_v38 = vadd.f32 %v1933_v36, %v2704_v0 }
 0x38c   : > { %v1935_v39 = vpop.f32.mrf.mxu1 }
 0x38d   : > { %1701 = vst.msk [vmem:[%s2709_s10 + $0x40] sm:$0xff] %vm1692_vm1, %v1662_v38  ;;  %v1936_v40 = vadd.f32 %v1935_v39, %v1934_v37 }
 0x38e   : > { %v1937_v41 = vpop.f32.mrf.mxu1 }
 0x38f   : > { %v1665_v42 = vadd.f32 %v1936_v40, %v2704_v0 }
 0x390   : > { %v1938_v43 = vpop.f32.mrf.mxu1 }
 0x391   : > { %1702 = vst.msk [vmem:[%s2709_s10 + $0x48] sm:$0xff] %vm1692_vm1, %v1665_v42  ;;  %v1939_v44 = vadd.f32 %v1938_v43, %v1937_v41 }
 0x392   : > { %v1940_v45 = vpop.f32.mrf.mxu1 }
 0x393   : > { %v1670_v46 = vadd.f32 %v1939_v44, %v2704_v0 }
 0x394   : > { %v1941_v47 = vpop.f32.mrf.mxu1 }
 0x395   : > { %1703 = vst.msk [vmem:[%s2709_s10 + $0x50] sm:$0xff] %vm1692_vm1, %v1670_v46  ;;  %v1942_v48 = vadd.f32 %v1941_v47, %v1940_v45 }
 0x396   : > { %v1943_v49 = vpop.f32.mrf.mxu1 }
 0x397   : > { %v1673_v50 = vadd.f32 %v1942_v48, %v2704_v0 }
 0x398   : > { %v1944_v51 = vpop.f32.mrf.mxu1 }
 0x399   : > { %1704 = vst.msk [vmem:[%s2709_s10 + $0x58] sm:$0xff] %vm1692_vm1, %v1673_v50  ;;  %v1945_v52 = vadd.f32 %v1944_v51, %v1943_v49 }
 0x39a   : > { %v1946_v53 = vpop.f32.mrf.mxu1 }
 0x39b   : > { %v1678_v54 = vadd.f32 %v1945_v52, %v2704_v0 }
 0x39c   : > { %v1947_v55 = vpop.f32.mrf.mxu1 }
 0x39d   : > { %1705 = vst.msk [vmem:[%s2709_s10 + $0x60] sm:$0xff] %vm1692_vm1, %v1678_v54  ;;  %v1948_v56 = vadd.f32 %v1947_v55, %v1946_v53 }
 0x39e   : > { %v1949_v57 = vpop.f32.mrf.mxu1 }
 0x39f   : > { %v1681_v58 = vadd.f32 %v1948_v56, %v2704_v0 }
 0x3a0   : > { %v1950_v59 = vpop.f32.mrf.mxu1 }
 0x3a1   : > { %1706 = vst.msk [vmem:[%s2709_s10 + $0x68] sm:$0xff] %vm1692_vm1, %v1681_v58  ;;  %v1951_v60 = vadd.f32 %v1950_v59, %v1949_v57 }
 0x3a2   : > { %v1952_v61 = vpop.f32.mrf.mxu1 }
 0x3a3   : > { %v1686_v9 = vadd.f32 %v1951_v60, %v2704_v0 }
 0x3a4   : > { %v1953_v8 = vpop.f32.mrf.mxu1 }
 0x3a5   : > { %1707 = vst.msk [vmem:[%s2709_s10 + $0x70] sm:$0xff] %vm1692_vm1, %v1686_v9  ;;  %v1954_v62 = vadd.f32 %v1953_v8, %v1952_v61 }
 0x3a7   : > { %v1689_v63 = vadd.f32 %v1954_v62, %v2704_v0 }
 0x3a9   : > { %1708 = vst.msk [vmem:[%s2709_s10 + $0x78] sm:$0xff] %vm1692_vm1, %v1689_v63 }
 0x3aa PF: > { %s19_s30 = sadd.s32 1, %s2133_s30  }
 0x3ab   : > { %p16_p4 = scmp.ge.s32.totalorder %s19_s30, 4  }
 0x3ad   :  { %18 = sbr.rel (!%p16_p4) target bundleno = 1 (0x1), region = 86 }

</bundles_post_ra>
